<compile_context>
chip_gen: v5e
topology: v5e:2x2
jax: 0.10.0
libtpu: 0.0.40
codegen_flags: <defaults>
</compile_context>

<pallas_src>
import functools

import jax
import jax.numpy as jnp
from jax.experimental import pallas as pl
from jax.experimental.pallas import tpu as pltpu


# ----------------------------------------------------------------------------
# Helpers
# ----------------------------------------------------------------------------
def _round_up(x, m):
    return ((x + m - 1) // m) * m


def _compute_vmem_limit_bytes():
    """Conservative per-core VMEM budget: ~3/4 of physical, clamped.
    v7x (64 MiB) -> 48 MiB, v5e/v6e (128 MiB) -> 96 MiB, fallback 48 MiB."""
    try:
        cap = int(getattr(pltpu.get_tpu_info(), "vmem_capacity_bytes", 0))
        if cap > 0:
            return max(32 * 1024 * 1024, min(100 * 1024 * 1024, (cap * 3) // 4))
    except Exception:
        pass
    return 48 * 1024 * 1024


_VMEM_LIMIT_BYTES = _compute_vmem_limit_bytes()


def _plan_tiles(M, K, N):
    """Tile-first selection (MXU / lane aligned), then round dims up to the tile."""
    # N (Cout): lane-dense output (multiple of 128); 512 tile for large Cout.
    n128 = _round_up(N, 128)
    tn = n128 if n128 <= 256 else 512
    Np = _round_up(N, tn)

    # K: single step whenever it fits; otherwise a multiple-of-256 tile that
    # minimizes zero padding (ties favour the larger tile -> fewer grid steps).
    k128 = _round_up(K, 128)
    if k128 <= 1024:
        tk, Kp = k128, k128
    else:
        tk = min((1024, 768, 512), key=lambda c: _round_up(K, c) - K)
        Kp = _round_up(K, tk)

    # M: multiple of 16 (bf16 sublane packing).  For non-tiny M force >=2
    # blocks so both v7x TensorCores get work on the "parallel" M axis.
    m16 = _round_up(M, 16)
    if m16 <= 256:
        tm = m16
    elif m16 <= 2048:
        tm = 256
    else:
        tm = 1024
    Mp = _round_up(M, tm)
    return tm, tk, tn, Mp, Kp, Np


# ----------------------------------------------------------------------------
# Pallas kernel: tiled matmul + per-channel affine (+ LeakyReLU) epilogue
# ----------------------------------------------------------------------------
def _conv_mm_kernel(p_ref, w_ref, s_ref, b_ref, o_ref, acc_ref, *, leaky):
    k = pl.program_id(2)

    @pl.when(k == 0)
    def _():
        acc_ref[...] = jnp.zeros_like(acc_ref)

    acc_ref[...] += jnp.dot(p_ref[...], w_ref[...],
                            preferred_element_type=jnp.float32)

    @pl.when(k == pl.num_programs(2) - 1)
    def _():
        y = acc_ref[...] * s_ref[...] + b_ref[...]
        if leaky:
            y = jnp.maximum(y, 0.1 * y)
        o_ref[...] = y.astype(o_ref.dtype)


# ----------------------------------------------------------------------------
# im2col (NHWC) — small static KH*KW tap loop, K ordered (Cin, KH, KW)
# ----------------------------------------------------------------------------
def _im2col_nhwc(x, ksize, stride, pad, k_target=None):
    B, H, W, C = x.shape
    OH = (H + 2 * pad - ksize) // stride + 1
    OW = (W + 2 * pad - ksize) // stride + 1
    if ksize == 1 and stride == 1 and pad == 0:
        # 1x1 conv: im2col is a pure reshape; K padding is a cheap channel pad
        # of x (no extra pass over the big (M, K) patches array).
        if k_target is not None and k_target > C:
            x = jnp.pad(x, ((0, 0), (0, 0), (0, 0), (0, k_target - C)))
        return x.reshape(B * OH * OW, x.shape[-1]), OH, OW
    if pad:
        x = jnp.pad(x, ((0, 0), (pad, pad), (pad, pad), (0, 0)))
    # TODO(synk): at real resolutions, build 3x3 patches inside the kernel from
    # a halo'd NHWC spatial tile (or 9 shifted matmuls over a resident tile)
    # instead of materializing this KH*KW HBM expansion.
    taps = []
    for i in range(ksize):
        for j in range(ksize):
            taps.append(x[:, i:i + stride * OH:stride, j:j + stride * OW:stride, :])
    p = jnp.stack(taps, axis=-1)                       # (B, OH, OW, C, KH*KW)
    p = p.reshape(B * OH * OW, C * ksize * ksize)
    if k_target is not None and k_target > C * ksize * ksize:
        p = jnp.pad(p, ((0, 0), (0, k_target - C * ksize * ksize)))
    return p, OH, OW


# ----------------------------------------------------------------------------
# Conv layer: im2col glue (fused under jit) + Pallas matmul/affine/activation
# ----------------------------------------------------------------------------
def conv2d_fused(x_nhwc, w, scale, shift, stride, pad, leaky):
    """x_nhwc: (B, H, W, Cin) bf16; w: (Cout, Cin, KH, KW) f32 (PyTorch layout).
    Returns (B, OH, OW, Cout) bf16."""
    B, H, W, _ = x_nhwc.shape
    Cout, Cin, KH, KW = w.shape
    OH = (H + 2 * pad - KH) // stride + 1
    OW = (W + 2 * pad - KW) // stride + 1
    M = B * OH * OW
    K = Cin * KH * KW

    tm, tk, tn, Mp, Kp, Np = _plan_tiles(M, K, Cout)

    # bf16 operands (f32 accumulation inside the kernel) halve HBM traffic.
    patches, _, _ = _im2col_nhwc(x_nhwc.astype(jnp.bfloat16), KH, stride, pad,
                                 k_target=Kp)
    if Mp != M:
        patches = jnp.pad(patches, ((0, Mp - M), (0, 0)))

    wmat = w.reshape(Cout, K).T.astype(jnp.bfloat16)            # (K, Cout)
    if (Kp, Np) != (K, Cout):
        wmat = jnp.pad(wmat, ((0, Kp - K), (0, Np - Cout)))
    scale2 = jnp.pad(scale.astype(jnp.float32).reshape(1, Cout),
                     ((0, 0), (0, Np - Cout)))
    shift2 = jnp.pad(shift.astype(jnp.float32).reshape(1, Cout),
                     ((0, 0), (0, Np - Cout)))

    grid = (Mp // tm, Np // tn, Kp // tk)
    kern = functools.partial(_conv_mm_kernel, leaky=leaky)

    out = pl.pallas_call(
        kern,
        out_shape=jax.ShapeDtypeStruct((Mp, Np), jnp.bfloat16),
        grid_spec=pltpu.PrefetchScalarGridSpec(
            num_scalar_prefetch=0,
            grid=grid,
            in_specs=[
                pl.BlockSpec((tm, tk), lambda i, j, k: (i, k)),
                pl.BlockSpec((tk, tn), lambda i, j, k: (k, j)),
                pl.BlockSpec((1, tn), lambda i, j, k: (0, j)),
                pl.BlockSpec((1, tn), lambda i, j, k: (0, j)),
            ],
            out_specs=pl.BlockSpec((tm, tn), lambda i, j, k: (i, j)),
            scratch_shapes=[pltpu.VMEM((tm, tn), jnp.float32)],
        ),
        compiler_params=pltpu.CompilerParams(
            dimension_semantics=("parallel", "parallel", "arbitrary"),
            vmem_limit_bytes=_VMEM_LIMIT_BYTES,
        ),
        cost_estimate=pl.CostEstimate(
            flops=2 * Mp * Kp * Np,
            transcendentals=0,
            bytes_accessed=Mp * Kp * 2 + Kp * Np * 2 + Mp * Np * 2 + 2 * Np * 4,
        ),
    )(patches, wmat, scale2, shift2)

    # TODO(synk): keep activations channel-padded (to Np) between conv layers
    # and slice only at route/shortcut/yolo boundaries to drop this slice+repad.
    return out[:M, :Cout].reshape(B, OH, OW, Cout)


# ----------------------------------------------------------------------------
# YOLO detection head transform (standard YOLOv3 predict_transform, NHWC input)
# ----------------------------------------------------------------------------
def predict_transform(pred_nhwc, inp_dim, anchors, num_classes):
    B, G = pred_nhwc.shape[0], pred_nhwc.shape[1]
    stride = inp_dim // G
    na = len(anchors)
    bbox = 5 + num_classes

    # NHWC (B, G, G, na*bbox) -> (B, G*G*na, bbox): same row ordering
    # (cell-major, anchor-minor) as the NCHW view/transpose/view sequence.
    p = pred_nhwc.astype(jnp.float32).reshape(B, G * G * na, bbox)
    anch = jnp.array([(a[0] / stride, a[1] / stride) for a in anchors],
                     jnp.float32)

    xy = jax.nn.sigmoid(p[..., 0:2])
    obj = jax.nn.sigmoid(p[..., 4:5])

    gr = jnp.arange(G, dtype=jnp.float32)
    a_, b_ = jnp.meshgrid(gr, gr)                     # a_: x offsets, b_: y
    xy_off = jnp.concatenate([a_.reshape(-1, 1), b_.reshape(-1, 1)], axis=1)
    xy_off = jnp.tile(xy_off, (1, na)).reshape(-1, 2)[None]   # (1, G*G*na, 2)
    xy = xy + xy_off

    wh = jnp.exp(p[..., 2:4]) * jnp.tile(anch, (G * G, 1))[None]
    cls = jax.nn.sigmoid(p[..., 5:])

    box = jnp.concatenate([xy, wh], axis=-1) * float(stride)
    return jnp.concatenate([box, obj, cls], axis=-1)


# ----------------------------------------------------------------------------
# In-script "parsed cfg" (what parse_cfg would return for a tiny YOLO net)
# ----------------------------------------------------------------------------
ANCHOR_STR = "10,13,16,30,33,23,30,61,62,45,59,119"
BLOCKS = [
    {"type": "net", "height": "16", "width": "16", "channels": "3"},
    {"type": "convolutional", "batch_normalize": "1", "filters": "8",
     "size": "3", "stride": "1", "pad": "1", "activation": "leaky"},          # 0: 16x16x8
    {"type": "convolutional", "batch_normalize": "1", "filters": "16",
     "size": "3", "stride": "2", "pad": "1", "activation": "leaky"},          # 1: 8x8x16
    {"type": "convolutional", "batch_normalize": "1", "filters": "16",
     "size": "1", "stride": "1", "pad": "1", "activation": "leaky"},          # 2: 8x8x16
    {"type": "shortcut", "from": "-2", "activation": "linear"},               # 3: 8x8x16
    {"type": "convolutional", "filters": "21", "size": "1", "stride": "1",
     "pad": "1", "activation": "linear"},                                     # 4: 8x8x21
    {"type": "yolo", "mask": "3,4,5", "anchors": ANCHOR_STR, "classes": "2",
     "num": "6"},                                                             # 5
    {"type": "route", "layers": "-4"},                                        # 6: -> layer 2
    {"type": "convolutional", "batch_normalize": "1", "filters": "8",
     "size": "1", "stride": "1", "pad": "1", "activation": "leaky"},          # 7: 8x8x8
    {"type": "upsample", "stride": "2"},                                      # 8: 16x16x8
    {"type": "route", "layers": "-1,-9"},                                     # 9: cat(8, layer0) -> 16x16x16
    {"type": "convolutional", "filters": "21", "size": "1", "stride": "1",
     "pad": "1", "activation": "linear"},                                     # 10: 16x16x21
    {"type": "yolo", "mask": "0,1,2", "anchors": ANCHOR_STR, "classes": "2",
     "num": "6"},                                                             # 11
]


# ----------------------------------------------------------------------------
# Darknet (Pallas/JAX version)
# ----------------------------------------------------------------------------
class DarknetPallas:
    def __init__(self, blocks, key):
        self.blocks = blocks
        self.net_info = blocks[0]
        self.params = []
        prev_filters = int(self.net_info.get("channels", 3))
        out_filters = []
        keys = jax.random.split(key, 128)
        ki = 0
        kernel = prev_filters
        for index, b in enumerate(blocks[1:]):
            p = None
            if b["type"] == "convolutional":
                bn = int(b.get("batch_normalize", 0))
                filters = int(b["filters"])
                ksize = int(b["size"])
                w = 0.1 * jax.random.normal(
                    keys[ki], (filters, prev_filters, ksize, ksize), jnp.float32)
                ki += 1
                if bn:
                    gamma = 1.0 + 0.1 * jax.random.normal(keys[ki], (filters,), jnp.float32); ki += 1
                    beta = 0.1 * jax.random.normal(keys[ki], (filters,), jnp.float32); ki += 1
                    rmean = 0.1 * jax.random.normal(keys[ki], (filters,), jnp.float32); ki += 1
                    rvar = 1.0 + 0.1 * jnp.abs(jax.random.normal(keys[ki], (filters,), jnp.float32)); ki += 1
                    scale = gamma / jnp.sqrt(rvar + 1e-5)
                    shift = beta - rmean * scale
                else:
                    bias = 0.1 * jax.random.normal(keys[ki], (filters,), jnp.float32); ki += 1
                    scale = jnp.ones((filters,), jnp.float32)
                    shift = bias
                p = (w, scale, shift)
                kernel = filters
            elif b["type"] == "route":
                layers = [int(l) for l in b["layers"].split(",")]
                start = layers[0]
                end = layers[1] if len(layers) > 1 else 0
                if start > 0:
                    start -= index
                if end > 0:
                    end -= index
                if end < 0:
                    kernel = out_filters[index + start] + out_filters[index + end]
                else:
                    kernel = out_filters[index + start]
            # shortcut / upsample / yolo keep the previous `kernel`
            self.params.append(p)
            prev_filters = kernel
            out_filters.append(kernel)

        # One jit for the whole forward pass: glue + pallas_calls fuse into a
        # single executable.
        self._jit_forward = jax.jit(self._forward)

    def _forward(self, x):
        # External interface is NCHW f32 (matches PyTorch); internal layout is
        # NHWC with bf16 activations end-to-end.
        x = x.transpose(0, 2, 3, 1).astype(jnp.bfloat16)
        modules = self.blocks[1:]
        output = {}
        detections = None
        for i, module in enumerate(modules):
            t = module["type"]
            if t == "convolutional":
                w, scale, shift = self.params[i]
                stride = int(module["stride"])
                ksize = int(module["size"])
                pad = (ksize - 1) // 2 if int(module["pad"]) else 0
                leaky = module["activation"] == "leaky"
                x = conv2d_fused(x, w, scale, shift, stride, pad, leaky)
            elif t == "upsample":
                # Nearest-neighbour 2x upsample via broadcast (no double repeat).
                B, H, W, C = x.shape
                x = jnp.broadcast_to(x[:, :, None, :, None, :],
                                     (B, H, 2, W, 2, C)).reshape(B, 2 * H, 2 * W, C)
            elif t == "route":
                layers = [int(l) for l in module["layers"].split(",")]
                if layers[0] > 0:
                    layers[0] -= i
                if len(layers) == 1:
                    x = output[i + layers[0]]
                else:
                    if layers[1] > 0:
                        layers[1] -= i
                    x = jnp.concatenate(
                        [output[i + layers[0]], output[i + layers[1]]], axis=-1)
            elif t == "shortcut":
                # Plain add inside the jit: a standalone Pallas kernel for a
                # tiny residual costs more in launch than it saves.
                frm = int(module["from"])
                x = output[i + frm] + output[i - 1]
            elif t == "yolo":
                mask = [int(m) for m in module["mask"].split(",")]
                anchors = [int(a) for a in module["anchors"].split(",")]
                anchors = [(anchors[k], anchors[k + 1]) for k in range(0, len(anchors), 2)]
                anchors = [anchors[m] for m in mask]
                in_dim = int(self.net_info["height"])
                num_classes = int(module["classes"])
                x = predict_transform(x, in_dim, anchors, num_classes)
                detections = x if detections is None else jnp.concatenate(
                    [detections, x], axis=1)
            output[i] = x
        return detections

    def forward(self, x):
        return self._jit_forward(x)


# ----------------------------------------------------------------------------
if __name__ == "__main__":
    key = jax.random.PRNGKey(0)
    kp, kx = jax.random.split(key)
    net = DarknetPallas(BLOCKS, kp)

    # Input: NCHW, batch=2, channels=3, spatial=16 (matches net height/width).
    x = jax.random.normal(kx, (2, 3, 16, 16), jnp.float32)

    detections = net.forward(x)
    detections = jax.block_until_ready(detections)

    # Expected shape: (2, 8*8*3 + 16*16*3, 5 + 2) = (2, 960, 7)
    assert detections.shape == (2, 960, 7), detections.shape
    assert bool(jnp.all(jnp.isfinite(detections)))
    print("KERNEL_OK")
</pallas_src>

<mosaic_0001>
module attributes {stable_mosaic.version = 11 : i64} {
  func.func @_conv_mm_kernel(%arg0: i32, %arg1: i32, %arg2: i32, %arg3: memref<256x128xbf16, #tpu.memory_space<vmem>>, %arg4: memref<128x128xbf16, #tpu.memory_space<vmem>>, %arg5: memref<1x128xf32, #tpu.memory_space<vmem>>, %arg6: memref<1x128xf32, #tpu.memory_space<vmem>>, %arg7: memref<256x128xbf16, #tpu.memory_space<vmem>>, %arg8: memref<256x128xf32, #tpu.memory_space<vmem>>) attributes {dimension_semantics = [#tpu.dimension_semantics<parallel>, #tpu.dimension_semantics<parallel>, #tpu.dimension_semantics<arbitrary>], iteration_bounds = array<i64: 2, 1, 1>, scalar_prefetch = 0 : i64, scratch_operands = 1 : i64, tpu.core_type = #tpu.core_type<tc>, window_params = [{transform_indices = @transform_0, window_bounds = array<i64: 256, 128>}, {transform_indices = @transform_1, window_bounds = array<i64: 128, 128>}, {transform_indices = @transform_2, window_bounds = array<i64: 1, 128>}, {transform_indices = @transform_3, window_bounds = array<i64: 1, 128>}, {transform_indices = @transform_4, window_bounds = array<i64: 256, 128>}]} {
    %c0_i32 = arith.constant 0 : i32
    %0 = arith.cmpi eq, %arg2, %c0_i32 : i32
    %1 = arith.extui %0 : i1 to i32
    %c0_i32_0 = arith.constant 0 : i32
    %2 = arith.cmpi ne, %1, %c0_i32_0 : i32
    scf.if %2 {
      %cst_10 = arith.constant 0.000000e+00 : f32
      %12 = vector.broadcast %cst_10 : f32 to vector<256x128xf32>
      %c0_11 = arith.constant 0 : index
      %c0_12 = arith.constant 0 : index
      %13 = vector.load %arg8[%c0_11, %c0_12] : memref<256x128xf32, #tpu.memory_space<vmem>>, vector<256x128xf32>
      tpu.vector_store %arg8[%c0_11, %c0_12], %12 {strides = array<i32>} : memref<256x128xf32, #tpu.memory_space<vmem>>, vector<256x128xf32>,
    } else {
    }
    %c0 = arith.constant 0 : index
    %c0_1 = arith.constant 0 : index
    %3 = vector.load %arg8[%c0, %c0_1] : memref<256x128xf32, #tpu.memory_space<vmem>>, vector<256x128xf32>
    %c0_2 = arith.constant 0 : index
    %c0_3 = arith.constant 0 : index
    %4 = vector.load %arg3[%c0_2, %c0_3] : memref<256x128xbf16, #tpu.memory_space<vmem>>, vector<256x128xbf16>
    %c0_4 = arith.constant 0 : index
    %c0_5 = arith.constant 0 : index
    %5 = vector.load %arg4[%c0_4, %c0_5] : memref<128x128xbf16, #tpu.memory_space<vmem>>, vector<128x128xbf16>
    %cst = arith.constant dense<0.000000e+00> : vector<256x128xf32>
    %6 = tpu.matmul %4, %5, %cst {dimension_numbers = #tpu.dot_dimension_numbers<[1], [0], [0], [1], [0, 0, 1, 1], [], []>} : vector<256x128xbf16>, vector<128x128xbf16>, vector<256x128xf32> -> vector<256x128xf32>
    %7 = arith.addf %3, %6 : vector<256x128xf32>
    %c0_6 = arith.constant 0 : index
    %c0_7 = arith.constant 0 : index
    %8 = vector.load %arg8[%c0_6, %c0_7] : memref<256x128xf32, #tpu.memory_space<vmem>>, vector<256x128xf32>
    tpu.vector_store %arg8[%c0_6, %c0_7], %7 {strides = array<i32>} : memref<256x128xf32, #tpu.memory_space<vmem>>, vector<256x128xf32>,
    %c0_i32_8 = arith.constant 0 : i32
    %9 = arith.cmpi eq, %arg2, %c0_i32_8 : i32
    %10 = arith.extui %9 : i1 to i32
    %c0_i32_9 = arith.constant 0 : i32
    %11 = arith.cmpi ne, %10, %c0_i32_9 : i32
    scf.if %11 {
      %c0_10 = arith.constant 0 : index
      %c0_11 = arith.constant 0 : index
      %12 = vector.load %arg8[%c0_10, %c0_11] : memref<256x128xf32, #tpu.memory_space<vmem>>, vector<256x128xf32>
      %c0_12 = arith.constant 0 : index
      %c0_13 = arith.constant 0 : index
      %13 = vector.load %arg5[%c0_12, %c0_13] : memref<1x128xf32, #tpu.memory_space<vmem>>, vector<1x128xf32>
      %14 = vector.broadcast %13 : vector<1x128xf32> to vector<256x128xf32>
      %15 = arith.mulf %12, %14 : vector<256x128xf32>
      %c0_14 = arith.constant 0 : index
      %c0_15 = arith.constant 0 : index
      %16 = vector.load %arg6[%c0_14, %c0_15] : memref<1x128xf32, #tpu.memory_space<vmem>>, vector<1x128xf32>
      %17 = vector.broadcast %16 : vector<1x128xf32> to vector<256x128xf32>
      %18 = arith.addf %15, %17 : vector<256x128xf32>
      %cst_16 = arith.constant 1.000000e-01 : f32
      %19 = vector.broadcast %cst_16 : f32 to vector<256x128xf32>
      %20 = arith.mulf %19, %18 : vector<256x128xf32>
      %21 = arith.maximumf %18, %20 : vector<256x128xf32>
      %22 = arith.truncf %21 : vector<256x128xf32> to vector<256x128xbf16>
      %c0_17 = arith.constant 0 : index
      %c0_18 = arith.constant 0 : index
      %23 = vector.load %arg7[%c0_17, %c0_18] : memref<256x128xbf16, #tpu.memory_space<vmem>>, vector<256x128xbf16>
      tpu.vector_store %arg7[%c0_17, %c0_18], %22 {strides = array<i32>} : memref<256x128xbf16, #tpu.memory_space<vmem>>, vector<256x128xbf16>,
    } else {
    }
    return
  }
  func.func @transform_0(%arg0: i32, %arg1: i32, %arg2: i32) -> (i32, i32) {
    %c0_i32 = arith.constant 0 : i32
    return %arg0, %arg2 : i32, i32
  }
  func.func @transform_1(%arg0: i32, %arg1: i32, %arg2: i32) -> (i32, i32) {
    %c0_i32 = arith.constant 0 : i32
    return %arg2, %arg1 : i32, i32
  }
  func.func @transform_2(%arg0: i32, %arg1: i32, %arg2: i32) -> (i32, i32) {
    %c0_i32 = arith.constant 0 : i32
    %c0_i32_0 = arith.constant 0 : i32
    return %c0_i32, %arg1 : i32, i32
  }
  func.func @transform_3(%arg0: i32, %arg1: i32, %arg2: i32) -> (i32, i32) {
    %c0_i32 = arith.constant 0 : i32
    %c0_i32_0 = arith.constant 0 : i32
    return %c0_i32, %arg1 : i32, i32
  }
  func.func @transform_4(%arg0: i32, %arg1: i32, %arg2: i32) -> (i32, i32) {
    %c0_i32 = arith.constant 0 : i32
    return %arg0, %arg1 : i32, i32
  }
}

module attributes {stable_mosaic.version = 11 : i64} {
  func.func @_conv_mm_kernel(%arg0: i32, %arg1: i32, %arg2: i32, %arg3: memref<128x128xbf16, #tpu.memory_space<vmem>>, %arg4: memref<128x128xbf16, #tpu.memory_space<vmem>>, %arg5: memref<1x128xf32, #tpu.memory_space<vmem>>, %arg6: memref<1x128xf32, #tpu.memory_space<vmem>>, %arg7: memref<128x128xbf16, #tpu.memory_space<vmem>>, %arg8: memref<128x128xf32, #tpu.memory_space<vmem>>) attributes {dimension_semantics = [#tpu.dimension_semantics<parallel>, #tpu.dimension_semantics<parallel>, #tpu.dimension_semantics<arbitrary>], iteration_bounds = array<i64: 1, 1, 1>, scalar_prefetch = 0 : i64, scratch_operands = 1 : i64, tpu.core_type = #tpu.core_type<tc>, window_params = [{transform_indices = @transform_0, window_bounds = array<i64: 128, 128>}, {transform_indices = @transform_1, window_bounds = array<i64: 128, 128>}, {transform_indices = @transform_2, window_bounds = array<i64: 1, 128>}, {transform_indices = @transform_3, window_bounds = array<i64: 1, 128>}, {transform_indices = @transform_4, window_bounds = array<i64: 128, 128>}]} {
    %c0_i32 = arith.constant 0 : i32
    %0 = arith.cmpi eq, %arg2, %c0_i32 : i32
    %1 = arith.extui %0 : i1 to i32
    %c0_i32_0 = arith.constant 0 : i32
    %2 = arith.cmpi ne, %1, %c0_i32_0 : i32
    scf.if %2 {
      %cst_10 = arith.constant 0.000000e+00 : f32
      %12 = vector.broadcast %cst_10 : f32 to vector<128x128xf32>
      %c0_11 = arith.constant 0 : index
      %c0_12 = arith.constant 0 : index
      %13 = vector.load %arg8[%c0_11, %c0_12] : memref<128x128xf32, #tpu.memory_space<vmem>>, vector<128x128xf32>
      tpu.vector_store %arg8[%c0_11, %c0_12], %12 {strides = array<i32>} : memref<128x128xf32, #tpu.memory_space<vmem>>, vector<128x128xf32>,
    } else {
    }
    %c0 = arith.constant 0 : index
    %c0_1 = arith.constant 0 : index
    %3 = vector.load %arg8[%c0, %c0_1] : memref<128x128xf32, #tpu.memory_space<vmem>>, vector<128x128xf32>
    %c0_2 = arith.constant 0 : index
    %c0_3 = arith.constant 0 : index
    %4 = vector.load %arg3[%c0_2, %c0_3] : memref<128x128xbf16, #tpu.memory_space<vmem>>, vector<128x128xbf16>
    %c0_4 = arith.constant 0 : index
    %c0_5 = arith.constant 0 : index
    %5 = vector.load %arg4[%c0_4, %c0_5] : memref<128x128xbf16, #tpu.memory_space<vmem>>, vector<128x128xbf16>
    %cst = arith.constant dense<0.000000e+00> : vector<128x128xf32>
    %6 = tpu.matmul %4, %5, %cst {dimension_numbers = #tpu.dot_dimension_numbers<[1], [0], [0], [1], [0, 0, 1, 1], [], []>} : vector<128x128xbf16>, vector<128x128xbf16>, vector<128x128xf32> -> vector<128x128xf32>
    %7 = arith.addf %3, %6 : vector<128x128xf32>
    %c0_6 = arith.constant 0 : index
    %c0_7 = arith.constant 0 : index
    %8 = vector.load %arg8[%c0_6, %c0_7] : memref<128x128xf32, #tpu.memory_space<vmem>>, vector<128x128xf32>
    tpu.vector_store %arg8[%c0_6, %c0_7], %7 {strides = array<i32>} : memref<128x128xf32, #tpu.memory_space<vmem>>, vector<128x128xf32>,
    %c0_i32_8 = arith.constant 0 : i32
    %9 = arith.cmpi eq, %arg2, %c0_i32_8 : i32
    %10 = arith.extui %9 : i1 to i32
    %c0_i32_9 = arith.constant 0 : i32
    %11 = arith.cmpi ne, %10, %c0_i32_9 : i32
    scf.if %11 {
      %c0_10 = arith.constant 0 : index
      %c0_11 = arith.constant 0 : index
      %12 = vector.load %arg8[%c0_10, %c0_11] : memref<128x128xf32, #tpu.memory_space<vmem>>, vector<128x128xf32>
      %c0_12 = arith.constant 0 : index
      %c0_13 = arith.constant 0 : index
      %13 = vector.load %arg5[%c0_12, %c0_13] : memref<1x128xf32, #tpu.memory_space<vmem>>, vector<1x128xf32>
      %14 = vector.broadcast %13 : vector<1x128xf32> to vector<128x128xf32>
      %15 = arith.mulf %12, %14 : vector<128x128xf32>
      %c0_14 = arith.constant 0 : index
      %c0_15 = arith.constant 0 : index
      %16 = vector.load %arg6[%c0_14, %c0_15] : memref<1x128xf32, #tpu.memory_space<vmem>>, vector<1x128xf32>
      %17 = vector.broadcast %16 : vector<1x128xf32> to vector<128x128xf32>
      %18 = arith.addf %15, %17 : vector<128x128xf32>
      %cst_16 = arith.constant 1.000000e-01 : f32
      %19 = vector.broadcast %cst_16 : f32 to vector<128x128xf32>
      %20 = arith.mulf %19, %18 : vector<128x128xf32>
      %21 = arith.maximumf %18, %20 : vector<128x128xf32>
      %22 = arith.truncf %21 : vector<128x128xf32> to vector<128x128xbf16>
      %c0_17 = arith.constant 0 : index
      %c0_18 = arith.constant 0 : index
      %23 = vector.load %arg7[%c0_17, %c0_18] : memref<128x128xbf16, #tpu.memory_space<vmem>>, vector<128x128xbf16>
      tpu.vector_store %arg7[%c0_17, %c0_18], %22 {strides = array<i32>} : memref<128x128xbf16, #tpu.memory_space<vmem>>, vector<128x128xbf16>,
    } else {
    }
    return
  }
  func.func @transform_0(%arg0: i32, %arg1: i32, %arg2: i32) -> (i32, i32) {
    %c0_i32 = arith.constant 0 : i32
    return %arg0, %arg2 : i32, i32
  }
  func.func @transform_1(%arg0: i32, %arg1: i32, %arg2: i32) -> (i32, i32) {
    %c0_i32 = arith.constant 0 : i32
    return %arg2, %arg1 : i32, i32
  }
  func.func @transform_2(%arg0: i32, %arg1: i32, %arg2: i32) -> (i32, i32) {
    %c0_i32 = arith.constant 0 : i32
    %c0_i32_0 = arith.constant 0 : i32
    return %c0_i32, %arg1 : i32, i32
  }
  func.func @transform_3(%arg0: i32, %arg1: i32, %arg2: i32) -> (i32, i32) {
    %c0_i32 = arith.constant 0 : i32
    %c0_i32_0 = arith.constant 0 : i32
    return %c0_i32, %arg1 : i32, i32
  }
  func.func @transform_4(%arg0: i32, %arg1: i32, %arg2: i32) -> (i32, i32) {
    %c0_i32 = arith.constant 0 : i32
    return %arg0, %arg1 : i32, i32
  }
}

module attributes {stable_mosaic.version = 11 : i64} {
  func.func @_conv_mm_kernel(%arg0: i32, %arg1: i32, %arg2: i32, %arg3: memref<128x128xbf16, #tpu.memory_space<vmem>>, %arg4: memref<128x128xbf16, #tpu.memory_space<vmem>>, %arg5: memref<1x128xf32, #tpu.memory_space<vmem>>, %arg6: memref<1x128xf32, #tpu.memory_space<vmem>>, %arg7: memref<128x128xbf16, #tpu.memory_space<vmem>>, %arg8: memref<128x128xf32, #tpu.memory_space<vmem>>) attributes {dimension_semantics = [#tpu.dimension_semantics<parallel>, #tpu.dimension_semantics<parallel>, #tpu.dimension_semantics<arbitrary>], iteration_bounds = array<i64: 1, 1, 1>, scalar_prefetch = 0 : i64, scratch_operands = 1 : i64, tpu.core_type = #tpu.core_type<tc>, window_params = [{transform_indices = @transform_0, window_bounds = array<i64: 128, 128>}, {transform_indices = @transform_1, window_bounds = array<i64: 128, 128>}, {transform_indices = @transform_2, window_bounds = array<i64: 1, 128>}, {transform_indices = @transform_3, window_bounds = array<i64: 1, 128>}, {transform_indices = @transform_4, window_bounds = array<i64: 128, 128>}]} {
    %c0_i32 = arith.constant 0 : i32
    %0 = arith.cmpi eq, %arg2, %c0_i32 : i32
    %1 = arith.extui %0 : i1 to i32
    %c0_i32_0 = arith.constant 0 : i32
    %2 = arith.cmpi ne, %1, %c0_i32_0 : i32
    scf.if %2 {
      %cst_10 = arith.constant 0.000000e+00 : f32
      %12 = vector.broadcast %cst_10 : f32 to vector<128x128xf32>
      %c0_11 = arith.constant 0 : index
      %c0_12 = arith.constant 0 : index
      %13 = vector.load %arg8[%c0_11, %c0_12] : memref<128x128xf32, #tpu.memory_space<vmem>>, vector<128x128xf32>
      tpu.vector_store %arg8[%c0_11, %c0_12], %12 {strides = array<i32>} : memref<128x128xf32, #tpu.memory_space<vmem>>, vector<128x128xf32>,
    } else {
    }
    %c0 = arith.constant 0 : index
    %c0_1 = arith.constant 0 : index
    %3 = vector.load %arg8[%c0, %c0_1] : memref<128x128xf32, #tpu.memory_space<vmem>>, vector<128x128xf32>
    %c0_2 = arith.constant 0 : index
    %c0_3 = arith.constant 0 : index
    %4 = vector.load %arg3[%c0_2, %c0_3] : memref<128x128xbf16, #tpu.memory_space<vmem>>, vector<128x128xbf16>
    %c0_4 = arith.constant 0 : index
    %c0_5 = arith.constant 0 : index
    %5 = vector.load %arg4[%c0_4, %c0_5] : memref<128x128xbf16, #tpu.memory_space<vmem>>, vector<128x128xbf16>
    %cst = arith.constant dense<0.000000e+00> : vector<128x128xf32>
    %6 = tpu.matmul %4, %5, %cst {dimension_numbers = #tpu.dot_dimension_numbers<[1], [0], [0], [1], [0, 0, 1, 1], [], []>} : vector<128x128xbf16>, vector<128x128xbf16>, vector<128x128xf32> -> vector<128x128xf32>
    %7 = arith.addf %3, %6 : vector<128x128xf32>
    %c0_6 = arith.constant 0 : index
    %c0_7 = arith.constant 0 : index
    %8 = vector.load %arg8[%c0_6, %c0_7] : memref<128x128xf32, #tpu.memory_space<vmem>>, vector<128x128xf32>
    tpu.vector_store %arg8[%c0_6, %c0_7], %7 {strides = array<i32>} : memref<128x128xf32, #tpu.memory_space<vmem>>, vector<128x128xf32>,
    %c0_i32_8 = arith.constant 0 : i32
    %9 = arith.cmpi eq, %arg2, %c0_i32_8 : i32
    %10 = arith.extui %9 : i1 to i32
    %c0_i32_9 = arith.constant 0 : i32
    %11 = arith.cmpi ne, %10, %c0_i32_9 : i32
    scf.if %11 {
      %c0_10 = arith.constant 0 : index
      %c0_11 = arith.constant 0 : index
      %12 = vector.load %arg8[%c0_10, %c0_11] : memref<128x128xf32, #tpu.memory_space<vmem>>, vector<128x128xf32>
      %c0_12 = arith.constant 0 : index
      %c0_13 = arith.constant 0 : index
      %13 = vector.load %arg5[%c0_12, %c0_13] : memref<1x128xf32, #tpu.memory_space<vmem>>, vector<1x128xf32>
      %14 = vector.broadcast %13 : vector<1x128xf32> to vector<128x128xf32>
      %15 = arith.mulf %12, %14 : vector<128x128xf32>
      %c0_14 = arith.constant 0 : index
      %c0_15 = arith.constant 0 : index
      %16 = vector.load %arg6[%c0_14, %c0_15] : memref<1x128xf32, #tpu.memory_space<vmem>>, vector<1x128xf32>
      %17 = vector.broadcast %16 : vector<1x128xf32> to vector<128x128xf32>
      %18 = arith.addf %15, %17 : vector<128x128xf32>
      %19 = arith.truncf %18 : vector<128x128xf32> to vector<128x128xbf16>
      %c0_16 = arith.constant 0 : index
      %c0_17 = arith.constant 0 : index
      %20 = vector.load %arg7[%c0_16, %c0_17] : memref<128x128xbf16, #tpu.memory_space<vmem>>, vector<128x128xbf16>
      tpu.vector_store %arg7[%c0_16, %c0_17], %19 {strides = array<i32>} : memref<128x128xbf16, #tpu.memory_space<vmem>>, vector<128x128xbf16>,
    } else {
    }
    return
  }
  func.func @transform_0(%arg0: i32, %arg1: i32, %arg2: i32) -> (i32, i32) {
    %c0_i32 = arith.constant 0 : i32
    return %arg0, %arg2 : i32, i32
  }
  func.func @transform_1(%arg0: i32, %arg1: i32, %arg2: i32) -> (i32, i32) {
    %c0_i32 = arith.constant 0 : i32
    return %arg2, %arg1 : i32, i32
  }
  func.func @transform_2(%arg0: i32, %arg1: i32, %arg2: i32) -> (i32, i32) {
    %c0_i32 = arith.constant 0 : i32
    %c0_i32_0 = arith.constant 0 : i32
    return %c0_i32, %arg1 : i32, i32
  }
  func.func @transform_3(%arg0: i32, %arg1: i32, %arg2: i32) -> (i32, i32) {
    %c0_i32 = arith.constant 0 : i32
    %c0_i32_0 = arith.constant 0 : i32
    return %c0_i32, %arg1 : i32, i32
  }
  func.func @transform_4(%arg0: i32, %arg1: i32, %arg2: i32) -> (i32, i32) {
    %c0_i32 = arith.constant 0 : i32
    return %arg0, %arg1 : i32, i32
  }
}

module attributes {stable_mosaic.version = 11 : i64} {
  func.func @_conv_mm_kernel(%arg0: i32, %arg1: i32, %arg2: i32, %arg3: memref<256x128xbf16, #tpu.memory_space<vmem>>, %arg4: memref<128x128xbf16, #tpu.memory_space<vmem>>, %arg5: memref<1x128xf32, #tpu.memory_space<vmem>>, %arg6: memref<1x128xf32, #tpu.memory_space<vmem>>, %arg7: memref<256x128xbf16, #tpu.memory_space<vmem>>, %arg8: memref<256x128xf32, #tpu.memory_space<vmem>>) attributes {dimension_semantics = [#tpu.dimension_semantics<parallel>, #tpu.dimension_semantics<parallel>, #tpu.dimension_semantics<arbitrary>], iteration_bounds = array<i64: 2, 1, 1>, scalar_prefetch = 0 : i64, scratch_operands = 1 : i64, tpu.core_type = #tpu.core_type<tc>, window_params = [{transform_indices = @transform_0, window_bounds = array<i64: 256, 128>}, {transform_indices = @transform_1, window_bounds = array<i64: 128, 128>}, {transform_indices = @transform_2, window_bounds = array<i64: 1, 128>}, {transform_indices = @transform_3, window_bounds = array<i64: 1, 128>}, {transform_indices = @transform_4, window_bounds = array<i64: 256, 128>}]} {
    %c0_i32 = arith.constant 0 : i32
    %0 = arith.cmpi eq, %arg2, %c0_i32 : i32
    %1 = arith.extui %0 : i1 to i32
    %c0_i32_0 = arith.constant 0 : i32
    %2 = arith.cmpi ne, %1, %c0_i32_0 : i32
    scf.if %2 {
      %cst_10 = arith.constant 0.000000e+00 : f32
      %12 = vector.broadcast %cst_10 : f32 to vector<256x128xf32>
      %c0_11 = arith.constant 0 : index
      %c0_12 = arith.constant 0 : index
      %13 = vector.load %arg8[%c0_11, %c0_12] : memref<256x128xf32, #tpu.memory_space<vmem>>, vector<256x128xf32>
      tpu.vector_store %arg8[%c0_11, %c0_12], %12 {strides = array<i32>} : memref<256x128xf32, #tpu.memory_space<vmem>>, vector<256x128xf32>,
    } else {
    }
    %c0 = arith.constant 0 : index
    %c0_1 = arith.constant 0 : index
    %3 = vector.load %arg8[%c0, %c0_1] : memref<256x128xf32, #tpu.memory_space<vmem>>, vector<256x128xf32>
    %c0_2 = arith.constant 0 : index
    %c0_3 = arith.constant 0 : index
    %4 = vector.load %arg3[%c0_2, %c0_3] : memref<256x128xbf16, #tpu.memory_space<vmem>>, vector<256x128xbf16>
    %c0_4 = arith.constant 0 : index
    %c0_5 = arith.constant 0 : index
    %5 = vector.load %arg4[%c0_4, %c0_5] : memref<128x128xbf16, #tpu.memory_space<vmem>>, vector<128x128xbf16>
    %cst = arith.constant dense<0.000000e+00> : vector<256x128xf32>
    %6 = tpu.matmul %4, %5, %cst {dimension_numbers = #tpu.dot_dimension_numbers<[1], [0], [0], [1], [0, 0, 1, 1], [], []>} : vector<256x128xbf16>, vector<128x128xbf16>, vector<256x128xf32> -> vector<256x128xf32>
    %7 = arith.addf %3, %6 : vector<256x128xf32>
    %c0_6 = arith.constant 0 : index
    %c0_7 = arith.constant 0 : index
    %8 = vector.load %arg8[%c0_6, %c0_7] : memref<256x128xf32, #tpu.memory_space<vmem>>, vector<256x128xf32>
    tpu.vector_store %arg8[%c0_6, %c0_7], %7 {strides = array<i32>} : memref<256x128xf32, #tpu.memory_space<vmem>>, vector<256x128xf32>,
    %c0_i32_8 = arith.constant 0 : i32
    %9 = arith.cmpi eq, %arg2, %c0_i32_8 : i32
    %10 = arith.extui %9 : i1 to i32
    %c0_i32_9 = arith.constant 0 : i32
    %11 = arith.cmpi ne, %10, %c0_i32_9 : i32
    scf.if %11 {
      %c0_10 = arith.constant 0 : index
      %c0_11 = arith.constant 0 : index
      %12 = vector.load %arg8[%c0_10, %c0_11] : memref<256x128xf32, #tpu.memory_space<vmem>>, vector<256x128xf32>
      %c0_12 = arith.constant 0 : index
      %c0_13 = arith.constant 0 : index
      %13 = vector.load %arg5[%c0_12, %c0_13] : memref<1x128xf32, #tpu.memory_space<vmem>>, vector<1x128xf32>
      %14 = vector.broadcast %13 : vector<1x128xf32> to vector<256x128xf32>
      %15 = arith.mulf %12, %14 : vector<256x128xf32>
      %c0_14 = arith.constant 0 : index
      %c0_15 = arith.constant 0 : index
      %16 = vector.load %arg6[%c0_14, %c0_15] : memref<1x128xf32, #tpu.memory_space<vmem>>, vector<1x128xf32>
      %17 = vector.broadcast %16 : vector<1x128xf32> to vector<256x128xf32>
      %18 = arith.addf %15, %17 : vector<256x128xf32>
      %19 = arith.truncf %18 : vector<256x128xf32> to vector<256x128xbf16>
      %c0_16 = arith.constant 0 : index
      %c0_17 = arith.constant 0 : index
      %20 = vector.load %arg7[%c0_16, %c0_17] : memref<256x128xbf16, #tpu.memory_space<vmem>>, vector<256x128xbf16>
      tpu.vector_store %arg7[%c0_16, %c0_17], %19 {strides = array<i32>} : memref<256x128xbf16, #tpu.memory_space<vmem>>, vector<256x128xbf16>,
    } else {
    }
    return
  }
  func.func @transform_0(%arg0: i32, %arg1: i32, %arg2: i32) -> (i32, i32) {
    %c0_i32 = arith.constant 0 : i32
    return %arg0, %arg2 : i32, i32
  }
  func.func @transform_1(%arg0: i32, %arg1: i32, %arg2: i32) -> (i32, i32) {
    %c0_i32 = arith.constant 0 : i32
    return %arg2, %arg1 : i32, i32
  }
  func.func @transform_2(%arg0: i32, %arg1: i32, %arg2: i32) -> (i32, i32) {
    %c0_i32 = arith.constant 0 : i32
    %c0_i32_0 = arith.constant 0 : i32
    return %c0_i32, %arg1 : i32, i32
  }
  func.func @transform_3(%arg0: i32, %arg1: i32, %arg2: i32) -> (i32, i32) {
    %c0_i32 = arith.constant 0 : i32
    %c0_i32_0 = arith.constant 0 : i32
    return %c0_i32, %arg1 : i32, i32
  }
  func.func @transform_4(%arg0: i32, %arg1: i32, %arg2: i32) -> (i32, i32) {
    %c0_i32 = arith.constant 0 : i32
    return %arg0, %arg1 : i32, i32
  }
}

</mosaic_0001>

<bundles_post_ra>
// kernel: _forward.6
= control target key start
LH: loop header
LB: loop body
LE: loop exit
PB: predicated region body
PF: predicated region fallthrough
CT: control target
= control target key end

     0   :  { %s1399_s15 = smov 0   ;;  %s1401_s16 = smov 0   ;;  %s1576_s0 = inlined_call_operand.vmem [shape: bf16[512,128], index: 0, kind: input, shape index: {}]   ;;  %s1577_s1 = inlined_call_operand.vmem [shape: bf16[128,128], index: 1, kind: input, shape index: {}]   ;;  %s1578_s2 = inlined_call_operand.vmem [shape: f32[1,128], index: 2, kind: input, shape index: {}]   ;;  %s1579_s3 = inlined_call_operand.vmem [shape: f32[1,128], index: 3, kind: input, shape index: {}]   ;;  %s1580_s4 = inlined_call_operand.vmem [shape: bf16[512,128], index: 4, kind: output, shape index: {}]  }
   0x1   :  { %s1403_s17 = smov 0  }
   0x2 LB: > { %s33_s18 = sadd.s32 1, %s1368_s16  ;;  %p1078_p0 = scmp.ge.s32.totalorder %s1372_s17, 1  ;;  %s1372_s17 = sphi %s1403_s17, %s14_s17   ;;  %s1368_s16 = sphi %s1401_s16, %s1582_s16   ;;  %s1364_s15 = sphi %s1399_s15, %s1581_s15  }
   0x3   : > { %p35_p1 = scmp.ge.s32.totalorder %s33_s18, 2  ;;  %p221_p2 = scmp.lt.s32.totalorder %s1372_s17, 3 }
   0x5   : > { %s1584_s18 = smov (%p35_p1, %s33_s18), 0  ;;  %p222_p3 = pnand %p1078_p0, %p221_p2 }
   0x6   : > { %s1079_s27 = sshll.u32 (!%p222_p3), %s1364_s15, 5 }
   0x7   : > { %225 = sbr.rel (%p222_p3) target bundleno = 245 (0xf5), region = 36  ;;  %p268_p4 = scmp.lt.s32.totalorder (!%p222_p3), %s1079_s27, 63 }
   0xc   : > { %v1204_v0 = vld [vmem:[%s1577_s1 + $0x38] sm:$0xff]  ;;  %v1203_v1 = vld [vmem:[%s1577_s1 + $0x30] sm:$0xff]  ;;  %v1202_v2 = vld [vmem:[%s1577_s1 + $0x28] sm:$0xff]  ;;  %s1586_s27 = smov (!%p268_p4, %s1079_s27), 63 }
   0xd   : > { %560 = vmatpush.bf16.msra.mxu0 %v1204_v0  ;;  %1300 = vmatpush.bf16.msra.mxu1 %v1204_v0  ;;  %v1201_v3 = vld [vmem:[%s1577_s1 + $0x20] sm:$0xff]  ;;  %v1200_v4 = vld [vmem:[%s1577_s1 + $0x18] sm:$0xff]  ;;  %v1199_v5 = vld [vmem:[%s1577_s1 + $0x10] sm:$0xff]  ;;  %s1080_s8 = sshll.u32 %s1586_s27, 2 }
   0xe   : > { %1301 = vmatpush.bf16.msra.mxu2 %v1204_v0  ;;  %1302 = vmatpush.bf16.msra.mxu3 %v1204_v0  ;;  %v1198_v6 = vld [vmem:[%s1577_s1 + $0x8] sm:$0xff]  ;;  %v1197_v7 = vld [vmem:[%s1577_s1] sm:$0xff]  ;;  %s1452_s13 = scalar_lea.vmem %s1576_s0, %s1080_s8  ;;  %s1497_s23 = scalar_lea.vmem %s1580_s4, %s1080_s8 }
   0xf   : > { %v1181_v8 = vld [vmem:[%s1452_s13] sm:$0xff]  ;;  %v1182_v12 = vld [vmem:[%s1452_s13 + $0x8] sm:$0xff]  ;;  %v1183_v16 = vld [vmem:[%s1452_s13 + $0x10] sm:$0xff] }
  0x10   : > { %v1185_v9 = vld [vmem:[%s1452_s13 + $0x20] sm:$0xff]  ;;  %v1186_v13 = vld [vmem:[%s1452_s13 + $0x28] sm:$0xff]  ;;  %v1187_v17 = vld [vmem:[%s1452_s13 + $0x30] sm:$0xff] }
  0x11   : > { %561 = vmatpush.bf16.msra.mxu0 %v1203_v1  ;;  %1303 = vmatpush.bf16.msra.mxu1 %v1203_v1  ;;  %v1189_v10 = vld [vmem:[%s1452_s13 + $0x40] sm:$0xff]  ;;  %v1190_v14 = vld [vmem:[%s1452_s13 + $0x48] sm:$0xff]  ;;  %v1191_v18 = vld [vmem:[%s1452_s13 + $0x50] sm:$0xff] }
  0x12   : > { %1304 = vmatpush.bf16.msra.mxu2 %v1203_v1  ;;  %1305 = vmatpush.bf16.msra.mxu3 %v1203_v1  ;;  %v1193_v11 = vld [vmem:[%s1452_s13 + $0x60] sm:$0xff]  ;;  %v1194_v15 = vld [vmem:[%s1452_s13 + $0x68] sm:$0xff]  ;;  %v1195_v19 = vld [vmem:[%s1452_s13 + $0x70] sm:$0xff] }
  0x13   : > { %v1184_v20 = vld [vmem:[%s1452_s13 + $0x18] sm:$0xff]  ;;  %v1473_v24 = vld [vmem:[%s1578_s2] ss:$0 sm:$0xff] }
  0x14   : > { %v1188_v21 = vld [vmem:[%s1452_s13 + $0x38] sm:$0xff]  ;;  %v1479_v28 = vld [vmem:[%s1579_s3] ss:$0 sm:$0xff] }
  0x15   : > { %562 = vmatpush.bf16.msra.mxu0 %v1202_v2  ;;  %1306 = vmatpush.bf16.msra.mxu1 %v1202_v2  ;;  %v1192_v22 = vld [vmem:[%s1452_s13 + $0x58] sm:$0xff] }
  0x16   : > { %1307 = vmatpush.bf16.msra.mxu2 %v1202_v2  ;;  %1308 = vmatpush.bf16.msra.mxu3 %v1202_v2  ;;  %v1196_v23 = vld [vmem:[%s1452_s13 + $0x78] sm:$0xff] }
  0x19   : > { %563 = vmatpush.bf16.msra.mxu0 %v1201_v3  ;;  %1309 = vmatpush.bf16.msra.mxu1 %v1201_v3 }
  0x1a   : > { %1310 = vmatpush.bf16.msra.mxu2 %v1201_v3  ;;  %1311 = vmatpush.bf16.msra.mxu3 %v1201_v3 }
  0x1d   : > { %564 = vmatpush.bf16.msra.mxu0 %v1200_v4  ;;  %1312 = vmatpush.bf16.msra.mxu1 %v1200_v4 }
  0x1e   : > { %1313 = vmatpush.bf16.msra.mxu2 %v1200_v4  ;;  %1314 = vmatpush.bf16.msra.mxu3 %v1200_v4 }
  0x21   : > { %565 = vmatpush.bf16.msra.mxu0 %v1199_v5  ;;  %1315 = vmatpush.bf16.msra.mxu1 %v1199_v5 }
  0x22   : > { %1316 = vmatpush.bf16.msra.mxu2 %v1199_v5  ;;  %1317 = vmatpush.bf16.msra.mxu3 %v1199_v5 }
  0x25   : > { %566 = vmatpush.bf16.msra.mxu0 %v1198_v6  ;;  %1318 = vmatpush.bf16.msra.mxu1 %v1198_v6 }
  0x26   : > { %1319 = vmatpush.bf16.msra.mxu2 %v1198_v6  ;;  %1320 = vmatpush.bf16.msra.mxu3 %v1198_v6 }
  0x29   : > { %567 = vmatpush.bf16.msra.mxu0 %v1197_v7  ;;  %1321 = vmatpush.bf16.msra.mxu1 %v1197_v7 }
  0x2a   : > { %1322 = vmatpush.bf16.msra.mxu2 %v1197_v7  ;;  %1323 = vmatpush.bf16.msra.mxu3 %v1197_v7 }
  0x2c   : > { %568 = vmatmul.bf16.vlgmr.msra.gmra.mxu0 %v1181_v8  ;;  %588 = vmatmul.bf16.vlgmr.msra.gmra.mxu1 %v1185_v9 }
  0x2d   : > { %608 = vmatmul.bf16.vlgmr.msra.gmra.mxu2 %v1189_v10  ;;  %628 = vmatmul.bf16.vlgmr.msra.gmra.mxu3 %v1193_v11 }
  0x3c   : > { %573 = vmatmul.bf16.gmra.mxu0 %v1182_v12  ;;  %593 = vmatmul.bf16.gmra.mxu1 %v1186_v13 }
  0x3d   : > { %613 = vmatmul.bf16.gmra.mxu2 %v1190_v14  ;;  %633 = vmatmul.bf16.gmra.mxu3 %v1194_v15 }
  0x4c   : > { %578 = vmatmul.bf16.gmra.mxu0 %v1183_v16  ;;  %598 = vmatmul.bf16.gmra.mxu1 %v1187_v17 }
  0x4d   : > { %618 = vmatmul.bf16.gmra.mxu2 %v1191_v18  ;;  %638 = vmatmul.bf16.gmra.mxu3 %v1195_v19 }
  0x5c   : > { %583 = vmatmul.bf16.gmra.mxu0 %v1184_v20  ;;  %603 = vmatmul.bf16.gmra.mxu1 %v1188_v21 }
  0x5d   : > { %623 = vmatmul.bf16.gmra.mxu2 %v1192_v22  ;;  %643 = vmatmul.bf16.gmra.mxu3 %v1196_v23 }
  0xa9   : > { %v569_v25 = vpop.f32.mrf.mxu0  ;;  %v589_v26 = vpop.f32.mrf.mxu1 }
  0xaa   : > { %v752_v27 = vmul.f32 %v1473_v24, %v569_v25  ;;  %v760_v29 = vmul.f32 %v1473_v24, %v589_v26 }
  0xac   : > { %v788_v30 = vadd.f32 %v1479_v28, %v752_v27  ;;  %v796_v31 = vadd.f32 %v1479_v28, %v760_v29 }
  0xae   : > { %v820_v40 = vmul.f32 0.1, %v788_v30  ;;  %v828_v41 = vmul.f32 0.1, %v796_v31 }
  0xb0   : > { %v609_v32 = vpop.f32.mrf.mxu2  ;;  %v629_v33 = vpop.f32.mrf.mxu3  ;;  %v852_v48 = vmax.f32 %v788_v30, %v820_v40  ;;  %v860_v49 = vmax.f32 %v796_v31, %v828_v41 }
  0xb1   : > { %v571_v34 = vpop.f32.mrf.mxu0  ;;  %v591_v35 = vpop.f32.mrf.mxu1  ;;  %v768_v38 = vmul.f32 %v1473_v24, %v609_v32  ;;  %v776_v39 = vmul.f32 %v1473_v24, %v629_v33 }
  0xb2   : > { %v753_v36 = vmul.f32 %v1473_v24, %v571_v34  ;;  %v761_v37 = vmul.f32 %v1473_v24, %v591_v35 }
  0xb3   : > { %v804_v46 = vadd.f32 %v1479_v28, %v768_v38  ;;  %v812_v47 = vadd.f32 %v1479_v28, %v776_v39 }
  0xb4   : > { %v789_v42 = vadd.f32 %v1479_v28, %v753_v36  ;;  %v797_v43 = vadd.f32 %v1479_v28, %v761_v37 }
  0xb5   : > { %v836_v60 = vmul.f32 0.1, %v804_v46  ;;  %v844_v61 = vmul.f32 0.1, %v812_v47 }
  0xb6   : > { %v821_v44 = vmul.f32 0.1, %v789_v42  ;;  %v829_v45 = vmul.f32 0.1, %v797_v43 }
  0xb7   : > { %v868_v4 = vmax.f32 %v804_v46, %v836_v60  ;;  %v876_v5 = vmax.f32 %v812_v47, %v844_v61 }
  0xb8   : > { %v853_v50 = vmax.f32 %v789_v42, %v821_v44  ;;  %v861_v51 = vmax.f32 %v797_v43, %v829_v45  ;;  %v611_v52 = vpop.f32.mrf.mxu2  ;;  %v631_v53 = vpop.f32.mrf.mxu3 }
  0xb9   : > { %v769_v54 = vmul.f32 %v1473_v24, %v611_v52  ;;  %v777_v55 = vmul.f32 %v1473_v24, %v631_v53  ;;  %v574_v56 = vpop.f32.mrf.mxu0  ;;  %v594_v57 = vpop.f32.mrf.mxu1 }
  0xba   : > { %v1208_v58 = vpack.c.bf16 %v853_v50, %v852_v48  ;;  %v1228_v59 = vpack.c.bf16 %v861_v51, %v860_v49  ;;  %v754_v0 = vmul.f32 %v1473_v24, %v574_v56  ;;  %v762_v1 = vmul.f32 %v1473_v24, %v594_v57 }
  0xbb   : > { %v805_v62 = vadd.f32 %v1479_v28, %v769_v54  ;;  %v813_v63 = vadd.f32 %v1479_v28, %v777_v55 }
  0xbc   : > { %1209 = vst [vmem:[%s1497_s23] sm:$0xff] %v1208_v58   ;;  %v790_v8 = vadd.f32 %v1479_v28, %v754_v0  ;;  %v798_v9 = vadd.f32 %v1479_v28, %v762_v1 }
  0xbd   : > { %1288 = vst [vmem:[%s1497_s23 + $0x20] sm:$0xff] %v1228_v59   ;;  %v837_v2 = vmul.f32 0.1, %v805_v62  ;;  %v845_v3 = vmul.f32 0.1, %v813_v63 }
  0xbe   : > { %v822_v20 = vmul.f32 0.1, %v790_v8  ;;  %v830_v21 = vmul.f32 0.1, %v798_v9 }
  0xbf   : > { %v869_v6 = vmax.f32 %v805_v62, %v837_v2  ;;  %v877_v7 = vmax.f32 %v813_v63, %v845_v3 }
  0xc0   : > { %v614_v10 = vpop.f32.mrf.mxu2  ;;  %v634_v11 = vpop.f32.mrf.mxu3  ;;  %v854_v30 = vmax.f32 %v790_v8, %v822_v20  ;;  %v862_v31 = vmax.f32 %v798_v9, %v830_v21 }
  0xc1   : > { %v1248_v12 = vpack.c.bf16 %v869_v6, %v868_v4  ;;  %v1268_v13 = vpack.c.bf16 %v877_v7, %v876_v5  ;;  %v576_v14 = vpop.f32.mrf.mxu0  ;;  %v596_v15 = vpop.f32.mrf.mxu1  ;;  %v770_v18 = vmul.f32 %v1473_v24, %v614_v10  ;;  %v778_v19 = vmul.f32 %v1473_v24, %v634_v11 }
  0xc2   : > { %v755_v16 = vmul.f32 %v1473_v24, %v576_v14  ;;  %v763_v17 = vmul.f32 %v1473_v24, %v596_v15 }
  0xc3   : > { %1292 = vst [vmem:[%s1497_s23 + $0x40] sm:$0xff] %v1248_v12   ;;  %v806_v27 = vadd.f32 %v1479_v28, %v770_v18  ;;  %v814_v29 = vadd.f32 %v1479_v28, %v778_v19 }
  0xc4   : > { %1296 = vst [vmem:[%s1497_s23 + $0x60] sm:$0xff] %v1268_v13   ;;  %v791_v22 = vadd.f32 %v1479_v28, %v755_v16  ;;  %v799_v23 = vadd.f32 %v1479_v28, %v763_v17 }
  0xc5   : > { %v838_v42 = vmul.f32 0.1, %v806_v27  ;;  %v846_v43 = vmul.f32 0.1, %v814_v29 }
  0xc6   : > { %v823_v25 = vmul.f32 0.1, %v791_v22  ;;  %v831_v26 = vmul.f32 0.1, %v799_v23 }
  0xc7   : > { %v870_v50 = vmax.f32 %v806_v27, %v838_v42  ;;  %v878_v51 = vmax.f32 %v814_v29, %v846_v43 }
  0xc8   : > { %v855_v32 = vmax.f32 %v791_v22, %v823_v25  ;;  %v863_v33 = vmax.f32 %v799_v23, %v831_v26  ;;  %v616_v34 = vpop.f32.mrf.mxu2  ;;  %v636_v35 = vpop.f32.mrf.mxu3 }
  0xc9   : > { %v771_v36 = vmul.f32 %v1473_v24, %v616_v34  ;;  %v779_v37 = vmul.f32 %v1473_v24, %v636_v35  ;;  %v579_v38 = vpop.f32.mrf.mxu0  ;;  %v599_v39 = vpop.f32.mrf.mxu1 }
  0xca   : > { %v1213_v40 = vpack.c.bf16 %v855_v32, %v854_v30  ;;  %v1233_v41 = vpack.c.bf16 %v863_v33, %v862_v31  ;;  %v756_v46 = vmul.f32 %v1473_v24, %v579_v38  ;;  %v764_v47 = vmul.f32 %v1473_v24, %v599_v39 }
  0xcb   : > { %v807_v44 = vadd.f32 %v1479_v28, %v771_v36  ;;  %v815_v45 = vadd.f32 %v1479_v28, %v779_v37 }
  0xcc   : > { %1285 = vst [vmem:[%s1497_s23 + $0x8] sm:$0xff] %v1213_v40   ;;  %v792_v54 = vadd.f32 %v1479_v28, %v756_v46  ;;  %v800_v55 = vadd.f32 %v1479_v28, %v764_v47 }
  0xcd   : > { %1289 = vst [vmem:[%s1497_s23 + $0x28] sm:$0xff] %v1233_v41   ;;  %v839_v48 = vmul.f32 0.1, %v807_v44  ;;  %v847_v49 = vmul.f32 0.1, %v815_v45 }
  0xce   : > { %v824_v2 = vmul.f32 0.1, %v792_v54  ;;  %v832_v3 = vmul.f32 0.1, %v800_v55 }
  0xcf   : > { %v871_v52 = vmax.f32 %v807_v44, %v839_v48  ;;  %v879_v53 = vmax.f32 %v815_v45, %v847_v49 }
  0xd0   : > { %v619_v56 = vpop.f32.mrf.mxu2  ;;  %v639_v57 = vpop.f32.mrf.mxu3  ;;  %v856_v10 = vmax.f32 %v792_v54, %v824_v2  ;;  %v864_v11 = vmax.f32 %v800_v55, %v832_v3 }
  0xd1   : > { %v1253_v58 = vpack.c.bf16 %v871_v52, %v870_v50  ;;  %v1273_v59 = vpack.c.bf16 %v879_v53, %v878_v51  ;;  %v581_v60 = vpop.f32.mrf.mxu0  ;;  %v601_v61 = vpop.f32.mrf.mxu1  ;;  %v772_v0 = vmul.f32 %v1473_v24, %v619_v56  ;;  %v780_v1 = vmul.f32 %v1473_v24, %v639_v57 }
  0xd2   : > { %v757_v62 = vmul.f32 %v1473_v24, %v581_v60  ;;  %v765_v63 = vmul.f32 %v1473_v24, %v601_v61 }
  0xd3   : > { %1293 = vst [vmem:[%s1497_s23 + $0x48] sm:$0xff] %v1253_v58   ;;  %v808_v8 = vadd.f32 %v1479_v28, %v772_v0  ;;  %v816_v9 = vadd.f32 %v1479_v28, %v780_v1 }
  0xd4   : > { %1297 = vst [vmem:[%s1497_s23 + $0x68] sm:$0xff] %v1273_v59   ;;  %v793_v4 = vadd.f32 %v1479_v28, %v757_v62  ;;  %v801_v5 = vadd.f32 %v1479_v28, %v765_v63 }
  0xd5   : > { %v840_v22 = vmul.f32 0.1, %v808_v8  ;;  %v848_v23 = vmul.f32 0.1, %v816_v9 }
  0xd6   : > { %v825_v6 = vmul.f32 0.1, %v793_v4  ;;  %v833_v7 = vmul.f32 0.1, %v801_v5 }
  0xd7   : > { %v872_v32 = vmax.f32 %v808_v8, %v840_v22  ;;  %v880_v33 = vmax.f32 %v816_v9, %v848_v23 }
  0xd8   : > { %v857_v12 = vmax.f32 %v793_v4, %v825_v6  ;;  %v865_v13 = vmax.f32 %v801_v5, %v833_v7  ;;  %v621_v14 = vpop.f32.mrf.mxu2  ;;  %v641_v15 = vpop.f32.mrf.mxu3 }
  0xd9   : > { %v773_v16 = vmul.f32 %v1473_v24, %v621_v14  ;;  %v781_v17 = vmul.f32 %v1473_v24, %v641_v15  ;;  %v584_v18 = vpop.f32.mrf.mxu0  ;;  %v604_v19 = vpop.f32.mrf.mxu1 }
  0xda   : > { %v1218_v20 = vpack.c.bf16 %v857_v12, %v856_v10  ;;  %v1238_v21 = vpack.c.bf16 %v865_v13, %v864_v11  ;;  %v758_v27 = vmul.f32 %v1473_v24, %v584_v18  ;;  %v766_v29 = vmul.f32 %v1473_v24, %v604_v19 }
  0xdb   : > { %v809_v25 = vadd.f32 %v1479_v28, %v773_v16  ;;  %v817_v26 = vadd.f32 %v1479_v28, %v781_v17 }
  0xdc   : > { %1286 = vst [vmem:[%s1497_s23 + $0x10] sm:$0xff] %v1218_v20   ;;  %v794_v36 = vadd.f32 %v1479_v28, %v758_v27  ;;  %v802_v37 = vadd.f32 %v1479_v28, %v766_v29 }
  0xdd   : > { %1290 = vst [vmem:[%s1497_s23 + $0x30] sm:$0xff] %v1238_v21   ;;  %v841_v30 = vmul.f32 0.1, %v809_v25  ;;  %v849_v31 = vmul.f32 0.1, %v817_v26 }
  0xde   : > { %v826_v48 = vmul.f32 0.1, %v794_v36  ;;  %v834_v49 = vmul.f32 0.1, %v802_v37 }
  0xdf   : > { %v873_v34 = vmax.f32 %v809_v25, %v841_v30  ;;  %v881_v35 = vmax.f32 %v817_v26, %v849_v31 }
  0xe0   : > { %v624_v38 = vpop.f32.mrf.mxu2  ;;  %v644_v39 = vpop.f32.mrf.mxu3  ;;  %v858_v56 = vmax.f32 %v794_v36, %v826_v48  ;;  %v866_v57 = vmax.f32 %v802_v37, %v834_v49 }
  0xe1   : > { %v1258_v40 = vpack.c.bf16 %v873_v34, %v872_v32  ;;  %v1278_v41 = vpack.c.bf16 %v881_v35, %v880_v33  ;;  %v586_v42 = vpop.f32.mrf.mxu0  ;;  %v606_v43 = vpop.f32.mrf.mxu1  ;;  %v774_v46 = vmul.f32 %v1473_v24, %v624_v38  ;;  %v782_v47 = vmul.f32 %v1473_v24, %v644_v39 }
  0xe2   : > { %v759_v44 = vmul.f32 %v1473_v24, %v586_v42  ;;  %v767_v45 = vmul.f32 %v1473_v24, %v606_v43 }
  0xe3   : > { %1294 = vst [vmem:[%s1497_s23 + $0x50] sm:$0xff] %v1258_v40   ;;  %v810_v54 = vadd.f32 %v1479_v28, %v774_v46  ;;  %v818_v55 = vadd.f32 %v1479_v28, %v782_v47 }
  0xe4   : > { %1298 = vst [vmem:[%s1497_s23 + $0x70] sm:$0xff] %v1278_v41   ;;  %v795_v50 = vadd.f32 %v1479_v28, %v759_v44  ;;  %v803_v51 = vadd.f32 %v1479_v28, %v767_v45 }
  0xe5   : > { %v842_v2 = vmul.f32 0.1, %v810_v54  ;;  %v850_v3 = vmul.f32 0.1, %v818_v55 }
  0xe6   : > { %v827_v52 = vmul.f32 0.1, %v795_v50  ;;  %v835_v53 = vmul.f32 0.1, %v803_v51 }
  0xe7   : > { %v874_v8 = vmax.f32 %v810_v54, %v842_v2  ;;  %v882_v9 = vmax.f32 %v818_v55, %v850_v3 }
  0xe8   : > { %v859_v58 = vmax.f32 %v795_v50, %v827_v52  ;;  %v867_v59 = vmax.f32 %v803_v51, %v835_v53  ;;  %v626_v60 = vpop.f32.mrf.mxu2  ;;  %v646_v61 = vpop.f32.mrf.mxu3 }
  0xe9   : > { %v775_v62 = vmul.f32 %v1473_v24, %v626_v60  ;;  %v783_v63 = vmul.f32 %v1473_v24, %v646_v61 }
  0xea   : > { %v1223_v0 = vpack.c.bf16 %v859_v58, %v858_v56  ;;  %v1243_v1 = vpack.c.bf16 %v867_v59, %v866_v57 }
  0xeb   : > { %v811_v4 = vadd.f32 %v1479_v28, %v775_v62  ;;  %v819_v5 = vadd.f32 %v1479_v28, %v783_v63 }
  0xec   : > { %1287 = vst [vmem:[%s1497_s23 + $0x18] sm:$0xff] %v1223_v0  }
  0xed   : > { %1291 = vst [vmem:[%s1497_s23 + $0x38] sm:$0xff] %v1243_v1   ;;  %v843_v6 = vmul.f32 0.1, %v811_v4  ;;  %v851_v7 = vmul.f32 0.1, %v819_v5 }
  0xef   : > { %v875_v10 = vmax.f32 %v811_v4, %v843_v6  ;;  %v883_v11 = vmax.f32 %v819_v5, %v851_v7 }
  0xf1   : > { %v1263_v12 = vpack.c.bf16 %v875_v10, %v874_v8  ;;  %v1283_v24 = vpack.c.bf16 %v883_v11, %v882_v9 }
  0xf3   : > { %1295 = vst [vmem:[%s1497_s23 + $0x58] sm:$0xff] %v1263_v12  }
  0xf4   : > { %1299 = vst [vmem:[%s1497_s23 + $0x78] sm:$0xff] %v1283_v24  }
  0xf5 PF: > { %s14_s17 = sadd.s32 1, %s1372_s17   ;;  %s1581_s15 = smov %s1368_s16 }
  0xf6   : > { %p11_p5 = scmp.ge.s32.totalorder %s14_s17, 4   ;;  %s1582_s16 = smov %s1584_s18 }
  0xf8   :  { %13 = sbr.rel (!%p11_p5) target bundleno = 2 (0x2), region = 83 }

// kernel: _forward.7
= control target key start
LH: loop header
LB: loop body
LE: loop exit
PB: predicated region body
PF: predicated region fallthrough
CT: control target
= control target key end

     0   :  { %s681_s1 = inlined_call_operand.vmem [shape: bf16[128,128], index: 1, kind: input, shape index: {}]   ;;  %s682_s2 = inlined_call_operand.vmem [shape: f32[1,128], index: 2, kind: input, shape index: {}]   ;;  %s683_s3 = inlined_call_operand.vmem [shape: f32[1,128], index: 3, kind: input, shape index: {}]   ;;  %s684_s0 = inlined_call_operand.vmem [shape: bf16[128,128], index: 0, kind: input, shape index: {}]   ;;  %s685_s4 = inlined_call_operand.vmem [shape: bf16[128,128], index: 4, kind: output, shape index: {}]  }
   0x1   :  { %v468_v0 = vld [vmem:[%s681_s1 + $0x38] sm:$0xff]  ;;  %v467_v1 = vld [vmem:[%s681_s1 + $0x30] sm:$0xff]  ;;  %v466_v2 = vld [vmem:[%s681_s1 + $0x28] sm:$0xff] }
   0x2   :  { %181 = vmatpush.bf16.msra.mxu0 %v468_v0  ;;  %516 = vmatpush.bf16.msra.mxu1 %v468_v0  ;;  %v465_v3 = vld [vmem:[%s681_s1 + $0x20] sm:$0xff]  ;;  %v464_v4 = vld [vmem:[%s681_s1 + $0x18] sm:$0xff]  ;;  %v463_v5 = vld [vmem:[%s681_s1 + $0x10] sm:$0xff] }
   0x3   :  { %517 = vmatpush.bf16.msra.mxu2 %v468_v0  ;;  %518 = vmatpush.bf16.msra.mxu3 %v468_v0  ;;  %v462_v6 = vld [vmem:[%s681_s1 + $0x8] sm:$0xff]  ;;  %v461_v7 = vld [vmem:[%s681_s1] sm:$0xff]  ;;  %v455_v9 = vld [vmem:[%s684_s0 + $0x10] sm:$0xff] }
   0x4   :  { %v453_v8 = vld [vmem:[%s684_s0] sm:$0xff]  ;;  %v459_v11 = vld [vmem:[%s684_s0 + $0x30] sm:$0xff]  ;;  %v454_v12 = vld [vmem:[%s684_s0 + $0x8] sm:$0xff] }
   0x5   :  { %v457_v10 = vld [vmem:[%s684_s0 + $0x20] sm:$0xff]  ;;  %v456_v13 = vld [vmem:[%s684_s0 + $0x18] sm:$0xff]  ;;  %v458_v14 = vld [vmem:[%s684_s0 + $0x28] sm:$0xff] }
   0x6   :  { %182 = vmatpush.bf16.msra.mxu0 %v467_v1  ;;  %519 = vmatpush.bf16.msra.mxu1 %v467_v1  ;;  %v460_v15 = vld [vmem:[%s684_s0 + $0x38] sm:$0xff]  ;;  %v618_v16 = vld [vmem:[%s682_s2] ss:$0 sm:$0xff] }
   0x7   :  { %520 = vmatpush.bf16.msra.mxu2 %v467_v1  ;;  %521 = vmatpush.bf16.msra.mxu3 %v467_v1  ;;  %v624_v20 = vld [vmem:[%s683_s3] ss:$0 sm:$0xff] }
   0xa   :  { %183 = vmatpush.bf16.msra.mxu0 %v466_v2  ;;  %522 = vmatpush.bf16.msra.mxu1 %v466_v2 }
   0xb   :  { %523 = vmatpush.bf16.msra.mxu2 %v466_v2  ;;  %524 = vmatpush.bf16.msra.mxu3 %v466_v2 }
   0xe   :  { %184 = vmatpush.bf16.msra.mxu0 %v465_v3  ;;  %525 = vmatpush.bf16.msra.mxu1 %v465_v3 }
   0xf   :  { %526 = vmatpush.bf16.msra.mxu2 %v465_v3  ;;  %527 = vmatpush.bf16.msra.mxu3 %v465_v3 }
  0x12   :  { %185 = vmatpush.bf16.msra.mxu0 %v464_v4  ;;  %528 = vmatpush.bf16.msra.mxu1 %v464_v4 }
  0x13   :  { %529 = vmatpush.bf16.msra.mxu2 %v464_v4  ;;  %530 = vmatpush.bf16.msra.mxu3 %v464_v4 }
  0x16   :  { %186 = vmatpush.bf16.msra.mxu0 %v463_v5  ;;  %531 = vmatpush.bf16.msra.mxu1 %v463_v5 }
  0x17   :  { %532 = vmatpush.bf16.msra.mxu2 %v463_v5  ;;  %533 = vmatpush.bf16.msra.mxu3 %v463_v5 }
  0x1a   :  { %187 = vmatpush.bf16.msra.mxu0 %v462_v6  ;;  %534 = vmatpush.bf16.msra.mxu1 %v462_v6 }
  0x1b   :  { %535 = vmatpush.bf16.msra.mxu2 %v462_v6  ;;  %536 = vmatpush.bf16.msra.mxu3 %v462_v6 }
  0x1e   :  { %188 = vmatpush.bf16.msra.mxu0 %v461_v7  ;;  %537 = vmatpush.bf16.msra.mxu1 %v461_v7 }
  0x1f   :  { %538 = vmatpush.bf16.msra.mxu2 %v461_v7  ;;  %539 = vmatpush.bf16.msra.mxu3 %v461_v7 }
  0x21   :  { %189 = vmatmul.bf16.vlgmr.msra.gmra.mxu0 %v453_v8  ;;  %199 = vmatmul.bf16.vlgmr.msra.gmra.mxu1 %v455_v9 }
  0x22   :  { %209 = vmatmul.bf16.vlgmr.msra.gmra.mxu2 %v457_v10  ;;  %219 = vmatmul.bf16.vlgmr.msra.gmra.mxu3 %v459_v11 }
  0x31   :  { %194 = vmatmul.bf16.gmra.mxu0 %v454_v12  ;;  %204 = vmatmul.bf16.gmra.mxu1 %v456_v13 }
  0x32   :  { %214 = vmatmul.bf16.gmra.mxu2 %v458_v14  ;;  %224 = vmatmul.bf16.gmra.mxu3 %v460_v15 }
  0x9e   :  { %v190_v17 = vpop.f32.mrf.mxu0  ;;  %v200_v18 = vpop.f32.mrf.mxu1 }
  0x9f   :  { %v285_v19 = vmul.f32 %v618_v16, %v190_v17  ;;  %v289_v21 = vmul.f32 %v618_v16, %v200_v18 }
  0xa1   :  { %v305_v22 = vadd.f32 %v624_v20, %v285_v19  ;;  %v309_v23 = vadd.f32 %v624_v20, %v289_v21 }
  0xa3   :  { %v321_v32 = vmul.f32 0.1, %v305_v22  ;;  %v325_v33 = vmul.f32 0.1, %v309_v23 }
  0xa5   :  { %v210_v24 = vpop.f32.mrf.mxu2  ;;  %v220_v25 = vpop.f32.mrf.mxu3  ;;  %v337_v40 = vmax.f32 %v305_v22, %v321_v32  ;;  %v341_v41 = vmax.f32 %v309_v23, %v325_v33 }
  0xa6   :  { %v192_v26 = vpop.f32.mrf.mxu0  ;;  %v202_v27 = vpop.f32.mrf.mxu1  ;;  %v293_v30 = vmul.f32 %v618_v16, %v210_v24  ;;  %v297_v31 = vmul.f32 %v618_v16, %v220_v25 }
  0xa7   :  { %v286_v28 = vmul.f32 %v618_v16, %v192_v26  ;;  %v290_v29 = vmul.f32 %v618_v16, %v202_v27 }
  0xa8   :  { %v313_v38 = vadd.f32 %v624_v20, %v293_v30  ;;  %v317_v39 = vadd.f32 %v624_v20, %v297_v31 }
  0xa9   :  { %v306_v34 = vadd.f32 %v624_v20, %v286_v28  ;;  %v310_v35 = vadd.f32 %v624_v20, %v290_v29 }
  0xaa   :  { %v329_v52 = vmul.f32 0.1, %v313_v38  ;;  %v333_v53 = vmul.f32 0.1, %v317_v39 }
  0xab   :  { %v322_v36 = vmul.f32 0.1, %v306_v34  ;;  %v326_v37 = vmul.f32 0.1, %v310_v35 }
  0xac   :  { %v345_v60 = vmax.f32 %v313_v38, %v329_v52  ;;  %v349_v61 = vmax.f32 %v317_v39, %v333_v53 }
  0xad   :  { %v338_v42 = vmax.f32 %v306_v34, %v322_v36  ;;  %v342_v43 = vmax.f32 %v310_v35, %v326_v37  ;;  %v212_v44 = vpop.f32.mrf.mxu2  ;;  %v222_v45 = vpop.f32.mrf.mxu3 }
  0xae   :  { %v294_v46 = vmul.f32 %v618_v16, %v212_v44  ;;  %v298_v47 = vmul.f32 %v618_v16, %v222_v45  ;;  %v195_v48 = vpop.f32.mrf.mxu0  ;;  %v205_v49 = vpop.f32.mrf.mxu1 }
  0xaf   :  { %v472_v50 = vpack.c.bf16 %v338_v42, %v337_v40  ;;  %v482_v51 = vpack.c.bf16 %v342_v43, %v341_v41  ;;  %v287_v56 = vmul.f32 %v618_v16, %v195_v48  ;;  %v291_v57 = vmul.f32 %v618_v16, %v205_v49 }
  0xb0   :  { %v314_v54 = vadd.f32 %v624_v20, %v294_v46  ;;  %v318_v55 = vadd.f32 %v624_v20, %v298_v47 }
  0xb1   :  { %473 = vst [vmem:[%s685_s4] sm:$0xff] %v472_v50   ;;  %v307_v0 = vadd.f32 %v624_v20, %v287_v56  ;;  %v311_v1 = vadd.f32 %v624_v20, %v291_v57 }
  0xb2   :  { %510 = vst [vmem:[%s685_s4 + $0x10] sm:$0xff] %v482_v51   ;;  %v330_v58 = vmul.f32 0.1, %v314_v54  ;;  %v334_v59 = vmul.f32 0.1, %v318_v55 }
  0xb3   :  { %v323_v12 = vmul.f32 0.1, %v307_v0  ;;  %v327_v13 = vmul.f32 0.1, %v311_v1 }
  0xb4   :  { %v346_v62 = vmax.f32 %v314_v54, %v330_v58  ;;  %v350_v63 = vmax.f32 %v318_v55, %v334_v59 }
  0xb5   :  { %v215_v2 = vpop.f32.mrf.mxu2  ;;  %v225_v3 = vpop.f32.mrf.mxu3  ;;  %v339_v22 = vmax.f32 %v307_v0, %v323_v12  ;;  %v343_v23 = vmax.f32 %v311_v1, %v327_v13 }
  0xb6   :  { %v492_v4 = vpack.c.bf16 %v346_v62, %v345_v60  ;;  %v502_v5 = vpack.c.bf16 %v350_v63, %v349_v61  ;;  %v197_v6 = vpop.f32.mrf.mxu0  ;;  %v207_v7 = vpop.f32.mrf.mxu1  ;;  %v295_v10 = vmul.f32 %v618_v16, %v215_v2  ;;  %v299_v11 = vmul.f32 %v618_v16, %v225_v3 }
  0xb7   :  { %v288_v8 = vmul.f32 %v618_v16, %v197_v6  ;;  %v292_v9 = vmul.f32 %v618_v16, %v207_v7 }
  0xb8   :  { %512 = vst [vmem:[%s685_s4 + $0x20] sm:$0xff] %v492_v4   ;;  %v315_v19 = vadd.f32 %v624_v20, %v295_v10  ;;  %v319_v21 = vadd.f32 %v624_v20, %v299_v11 }
  0xb9   :  { %514 = vst [vmem:[%s685_s4 + $0x30] sm:$0xff] %v502_v5   ;;  %v308_v14 = vadd.f32 %v624_v20, %v288_v8  ;;  %v312_v15 = vadd.f32 %v624_v20, %v292_v9 }
  0xba   :  { %v331_v32 = vmul.f32 0.1, %v315_v19  ;;  %v335_v33 = vmul.f32 0.1, %v319_v21 }
  0xbb   :  { %v324_v17 = vmul.f32 0.1, %v308_v14  ;;  %v328_v18 = vmul.f32 0.1, %v312_v15 }
  0xbc   :  { %v347_v38 = vmax.f32 %v315_v19, %v331_v32 }
  0xbd   :  { %v340_v24 = vmax.f32 %v308_v14, %v324_v17  ;;  %v344_v25 = vmax.f32 %v312_v15, %v328_v18  ;;  %v217_v26 = vpop.f32.mrf.mxu2  ;;  %v227_v27 = vpop.f32.mrf.mxu3 }
  0xbe   :  { %v296_v28 = vmul.f32 %v618_v16, %v217_v26  ;;  %v300_v29 = vmul.f32 %v618_v16, %v227_v27  ;;  %v351_v16 = vmax.f32 %v319_v21, %v335_v33 }
  0xbf   :  { %v477_v30 = vpack.c.bf16 %v340_v24, %v339_v22  ;;  %v487_v31 = vpack.c.bf16 %v344_v25, %v343_v23 }
  0xc0   :  { %v316_v34 = vadd.f32 %v624_v20, %v296_v28  ;;  %v320_v35 = vadd.f32 %v624_v20, %v300_v29 }
  0xc1   :  { %509 = vst [vmem:[%s685_s4 + $0x8] sm:$0xff] %v477_v30  }
  0xc2   :  { %511 = vst [vmem:[%s685_s4 + $0x18] sm:$0xff] %v487_v31   ;;  %v332_v36 = vmul.f32 0.1, %v316_v34  ;;  %v336_v37 = vmul.f32 0.1, %v320_v35 }
  0xc4   :  { %v348_v39 = vmax.f32 %v316_v34, %v332_v36  ;;  %v352_v40 = vmax.f32 %v320_v35, %v336_v37 }
  0xc6   :  { %v497_v41 = vpack.c.bf16 %v348_v39, %v347_v38  ;;  %v507_v42 = vpack.c.bf16 %v352_v40, %v351_v16 }
  0xc8   :  { %513 = vst [vmem:[%s685_s4 + $0x28] sm:$0xff] %v497_v41  }
  0xc9   :  { %515 = vst [vmem:[%s685_s4 + $0x38] sm:$0xff] %v507_v42  }

// kernel: _forward.9
= control target key start
LH: loop header
LB: loop body
LE: loop exit
PB: predicated region body
PF: predicated region fallthrough
CT: control target
= control target key end

     0   :  { %s613_s1 = inlined_call_operand.vmem [shape: bf16[128,128], index: 1, kind: input, shape index: {}]   ;;  %s614_s2 = inlined_call_operand.vmem [shape: f32[1,128], index: 2, kind: input, shape index: {}]   ;;  %s615_s3 = inlined_call_operand.vmem [shape: f32[1,128], index: 3, kind: input, shape index: {}]   ;;  %s616_s0 = inlined_call_operand.vmem [shape: bf16[128,128], index: 0, kind: input, shape index: {}]   ;;  %s617_s4 = inlined_call_operand.vmem [shape: bf16[128,128], index: 4, kind: output, shape index: {}]  }
   0x1   :  { %v436_v0 = vld [vmem:[%s613_s1 + $0x38] sm:$0xff]  ;;  %v435_v1 = vld [vmem:[%s613_s1 + $0x30] sm:$0xff]  ;;  %v434_v2 = vld [vmem:[%s613_s1 + $0x28] sm:$0xff] }
   0x2   :  { %181 = vmatpush.bf16.msra.mxu0 %v436_v0  ;;  %484 = vmatpush.bf16.msra.mxu1 %v436_v0  ;;  %v433_v3 = vld [vmem:[%s613_s1 + $0x20] sm:$0xff]  ;;  %v432_v4 = vld [vmem:[%s613_s1 + $0x18] sm:$0xff]  ;;  %v431_v5 = vld [vmem:[%s613_s1 + $0x10] sm:$0xff] }
   0x3   :  { %485 = vmatpush.bf16.msra.mxu2 %v436_v0  ;;  %486 = vmatpush.bf16.msra.mxu3 %v436_v0  ;;  %v430_v6 = vld [vmem:[%s613_s1 + $0x8] sm:$0xff]  ;;  %v429_v7 = vld [vmem:[%s613_s1] sm:$0xff]  ;;  %v423_v9 = vld [vmem:[%s616_s0 + $0x10] sm:$0xff] }
   0x4   :  { %v421_v8 = vld [vmem:[%s616_s0] sm:$0xff]  ;;  %v427_v11 = vld [vmem:[%s616_s0 + $0x30] sm:$0xff]  ;;  %v422_v12 = vld [vmem:[%s616_s0 + $0x8] sm:$0xff] }
   0x5   :  { %v425_v10 = vld [vmem:[%s616_s0 + $0x20] sm:$0xff]  ;;  %v424_v13 = vld [vmem:[%s616_s0 + $0x18] sm:$0xff]  ;;  %v426_v14 = vld [vmem:[%s616_s0 + $0x28] sm:$0xff] }
   0x6   :  { %182 = vmatpush.bf16.msra.mxu0 %v435_v1  ;;  %487 = vmatpush.bf16.msra.mxu1 %v435_v1  ;;  %v428_v15 = vld [vmem:[%s616_s0 + $0x38] sm:$0xff]  ;;  %v508_v18 = vld [vmem:[%s614_s2] ss:$0 sm:$0xff] }
   0x7   :  { %488 = vmatpush.bf16.msra.mxu2 %v435_v1  ;;  %489 = vmatpush.bf16.msra.mxu3 %v435_v1  ;;  %v509_v20 = vld [vmem:[%s615_s3] ss:$0 sm:$0xff] }
   0xa   :  { %183 = vmatpush.bf16.msra.mxu0 %v434_v2  ;;  %490 = vmatpush.bf16.msra.mxu1 %v434_v2 }
   0xb   :  { %491 = vmatpush.bf16.msra.mxu2 %v434_v2  ;;  %492 = vmatpush.bf16.msra.mxu3 %v434_v2 }
   0xe   :  { %184 = vmatpush.bf16.msra.mxu0 %v433_v3  ;;  %493 = vmatpush.bf16.msra.mxu1 %v433_v3 }
   0xf   :  { %494 = vmatpush.bf16.msra.mxu2 %v433_v3  ;;  %495 = vmatpush.bf16.msra.mxu3 %v433_v3 }
  0x12   :  { %185 = vmatpush.bf16.msra.mxu0 %v432_v4  ;;  %496 = vmatpush.bf16.msra.mxu1 %v432_v4 }
  0x13   :  { %497 = vmatpush.bf16.msra.mxu2 %v432_v4  ;;  %498 = vmatpush.bf16.msra.mxu3 %v432_v4 }
  0x16   :  { %186 = vmatpush.bf16.msra.mxu0 %v431_v5  ;;  %499 = vmatpush.bf16.msra.mxu1 %v431_v5 }
  0x17   :  { %500 = vmatpush.bf16.msra.mxu2 %v431_v5  ;;  %501 = vmatpush.bf16.msra.mxu3 %v431_v5 }
  0x1a   :  { %187 = vmatpush.bf16.msra.mxu0 %v430_v6  ;;  %502 = vmatpush.bf16.msra.mxu1 %v430_v6 }
  0x1b   :  { %503 = vmatpush.bf16.msra.mxu2 %v430_v6  ;;  %504 = vmatpush.bf16.msra.mxu3 %v430_v6 }
  0x1e   :  { %188 = vmatpush.bf16.msra.mxu0 %v429_v7  ;;  %505 = vmatpush.bf16.msra.mxu1 %v429_v7 }
  0x1f   :  { %506 = vmatpush.bf16.msra.mxu2 %v429_v7  ;;  %507 = vmatpush.bf16.msra.mxu3 %v429_v7 }
  0x21   :  { %189 = vmatmul.bf16.vlgmr.msra.gmra.mxu0 %v421_v8  ;;  %199 = vmatmul.bf16.vlgmr.msra.gmra.mxu1 %v423_v9 }
  0x22   :  { %209 = vmatmul.bf16.vlgmr.msra.gmra.mxu2 %v425_v10  ;;  %219 = vmatmul.bf16.vlgmr.msra.gmra.mxu3 %v427_v11 }
  0x31   :  { %194 = vmatmul.bf16.gmra.mxu0 %v422_v12  ;;  %204 = vmatmul.bf16.gmra.mxu1 %v424_v13 }
  0x32   :  { %214 = vmatmul.bf16.gmra.mxu2 %v426_v14  ;;  %224 = vmatmul.bf16.gmra.mxu3 %v428_v15 }
  0x9e   :  { %v190_v16 = vpop.f32.mrf.mxu0  ;;  %v200_v17 = vpop.f32.mrf.mxu1 }
  0x9f   :  { %v285_v19 = vmul.f32 %v508_v18, %v190_v16  ;;  %v289_v21 = vmul.f32 %v508_v18, %v200_v17 }
  0xa1   :  { %v305_v28 = vadd.f32 %v509_v20, %v285_v19  ;;  %v309_v29 = vadd.f32 %v509_v20, %v289_v21 }
  0xa5   :  { %v210_v22 = vpop.f32.mrf.mxu2  ;;  %v220_v23 = vpop.f32.mrf.mxu3 }
  0xa6   :  { %v192_v24 = vpop.f32.mrf.mxu0  ;;  %v202_v25 = vpop.f32.mrf.mxu1  ;;  %v293_v34 = vmul.f32 %v508_v18, %v210_v22  ;;  %v297_v35 = vmul.f32 %v508_v18, %v220_v23 }
  0xa7   :  { %v286_v26 = vmul.f32 %v508_v18, %v192_v24  ;;  %v290_v27 = vmul.f32 %v508_v18, %v202_v25 }
  0xa8   :  { %v313_v42 = vadd.f32 %v509_v20, %v293_v34  ;;  %v317_v43 = vadd.f32 %v509_v20, %v297_v35 }
  0xa9   :  { %v306_v30 = vadd.f32 %v509_v20, %v286_v26  ;;  %v310_v31 = vadd.f32 %v509_v20, %v290_v27 }
  0xab   :  { %v440_v32 = vpack.c.bf16 %v306_v30, %v305_v28  ;;  %v450_v33 = vpack.c.bf16 %v310_v31, %v309_v29 }
  0xad   :  { %441 = vst [vmem:[%s617_s4] sm:$0xff] %v440_v32   ;;  %v212_v36 = vpop.f32.mrf.mxu2  ;;  %v222_v37 = vpop.f32.mrf.mxu3 }
  0xae   :  { %478 = vst [vmem:[%s617_s4 + $0x10] sm:$0xff] %v450_v33   ;;  %v294_v38 = vmul.f32 %v508_v18, %v212_v36  ;;  %v298_v39 = vmul.f32 %v508_v18, %v222_v37  ;;  %v195_v40 = vpop.f32.mrf.mxu0  ;;  %v205_v41 = vpop.f32.mrf.mxu1 }
  0xaf   :  { %v287_v48 = vmul.f32 %v508_v18, %v195_v40  ;;  %v291_v49 = vmul.f32 %v508_v18, %v205_v41 }
  0xb0   :  { %v314_v44 = vadd.f32 %v509_v20, %v294_v38  ;;  %v318_v45 = vadd.f32 %v509_v20, %v298_v39 }
  0xb1   :  { %v307_v56 = vadd.f32 %v509_v20, %v287_v48  ;;  %v311_v57 = vadd.f32 %v509_v20, %v291_v49 }
  0xb2   :  { %v460_v46 = vpack.c.bf16 %v314_v44, %v313_v42  ;;  %v470_v47 = vpack.c.bf16 %v318_v45, %v317_v43 }
  0xb4   :  { %480 = vst [vmem:[%s617_s4 + $0x20] sm:$0xff] %v460_v46  }
  0xb5   :  { %482 = vst [vmem:[%s617_s4 + $0x30] sm:$0xff] %v470_v47   ;;  %v215_v50 = vpop.f32.mrf.mxu2  ;;  %v225_v51 = vpop.f32.mrf.mxu3 }
  0xb6   :  { %v197_v52 = vpop.f32.mrf.mxu0  ;;  %v207_v53 = vpop.f32.mrf.mxu1  ;;  %v295_v62 = vmul.f32 %v508_v18, %v215_v50  ;;  %v299_v63 = vmul.f32 %v508_v18, %v225_v51 }
  0xb7   :  { %v288_v54 = vmul.f32 %v508_v18, %v197_v52  ;;  %v292_v55 = vmul.f32 %v508_v18, %v207_v53 }
  0xb8   :  { %v315_v4 = vadd.f32 %v509_v20, %v295_v62  ;;  %v319_v5 = vadd.f32 %v509_v20, %v299_v63 }
  0xb9   :  { %v308_v58 = vadd.f32 %v509_v20, %v288_v54  ;;  %v312_v59 = vadd.f32 %v509_v20, %v292_v55 }
  0xbb   :  { %v445_v60 = vpack.c.bf16 %v308_v58, %v307_v56  ;;  %v455_v61 = vpack.c.bf16 %v312_v59, %v311_v57 }
  0xbd   :  { %477 = vst [vmem:[%s617_s4 + $0x8] sm:$0xff] %v445_v60   ;;  %v217_v0 = vpop.f32.mrf.mxu2  ;;  %v227_v1 = vpop.f32.mrf.mxu3 }
  0xbe   :  { %479 = vst [vmem:[%s617_s4 + $0x18] sm:$0xff] %v455_v61   ;;  %v296_v2 = vmul.f32 %v508_v18, %v217_v0  ;;  %v300_v3 = vmul.f32 %v508_v18, %v227_v1 }
  0xc0   :  { %v316_v6 = vadd.f32 %v509_v20, %v296_v2  ;;  %v320_v7 = vadd.f32 %v509_v20, %v300_v3 }
  0xc2   :  { %v465_v8 = vpack.c.bf16 %v316_v6, %v315_v4  ;;  %v475_v9 = vpack.c.bf16 %v320_v7, %v319_v5 }
  0xc4   :  { %481 = vst [vmem:[%s617_s4 + $0x28] sm:$0xff] %v465_v8  }
  0xc5   :  { %483 = vst [vmem:[%s617_s4 + $0x38] sm:$0xff] %v475_v9  }

// kernel: _forward.11
= control target key start
LH: loop header
LB: loop body
LE: loop exit
PB: predicated region body
PF: predicated region fallthrough
CT: control target
= control target key end

     0   :  { %s1335_s15 = smov 0   ;;  %s1337_s16 = smov 0   ;;  %s1512_s0 = inlined_call_operand.vmem [shape: bf16[512,128], index: 0, kind: input, shape index: {}]   ;;  %s1513_s1 = inlined_call_operand.vmem [shape: bf16[128,128], index: 1, kind: input, shape index: {}]   ;;  %s1514_s2 = inlined_call_operand.vmem [shape: f32[1,128], index: 2, kind: input, shape index: {}]   ;;  %s1515_s3 = inlined_call_operand.vmem [shape: f32[1,128], index: 3, kind: input, shape index: {}]   ;;  %s1516_s4 = inlined_call_operand.vmem [shape: bf16[512,128], index: 4, kind: output, shape index: {}]  }
   0x1   :  { %s1339_s17 = smov 0  }
   0x2 LB: > { %s33_s18 = sadd.s32 1, %s1304_s16  ;;  %p1014_p0 = scmp.ge.s32.totalorder %s1308_s17, 1  ;;  %s1308_s17 = sphi %s1339_s17, %s14_s17   ;;  %s1304_s16 = sphi %s1337_s16, %s1518_s16   ;;  %s1300_s15 = sphi %s1335_s15, %s1517_s15  }
   0x3   : > { %p35_p1 = scmp.ge.s32.totalorder %s33_s18, 2  ;;  %p221_p2 = scmp.lt.s32.totalorder %s1308_s17, 3 }
   0x5   : > { %s1520_s18 = smov (%p35_p1, %s33_s18), 0  ;;  %p222_p3 = pnand %p1014_p0, %p221_p2 }
   0x6   : > { %s1015_s27 = sshll.u32 (!%p222_p3), %s1300_s15, 5 }
   0x7   : > { %225 = sbr.rel (%p222_p3) target bundleno = 241 (0xf1), region = 36  ;;  %p268_p4 = scmp.lt.s32.totalorder (!%p222_p3), %s1015_s27, 63 }
   0xc   : > { %v1140_v0 = vld [vmem:[%s1513_s1 + $0x38] sm:$0xff]  ;;  %v1139_v1 = vld [vmem:[%s1513_s1 + $0x30] sm:$0xff]  ;;  %v1138_v2 = vld [vmem:[%s1513_s1 + $0x28] sm:$0xff]  ;;  %s1522_s27 = smov (!%p268_p4, %s1015_s27), 63 }
   0xd   : > { %560 = vmatpush.bf16.msra.mxu0 %v1140_v0  ;;  %1236 = vmatpush.bf16.msra.mxu1 %v1140_v0  ;;  %v1137_v3 = vld [vmem:[%s1513_s1 + $0x20] sm:$0xff]  ;;  %v1136_v4 = vld [vmem:[%s1513_s1 + $0x18] sm:$0xff]  ;;  %v1135_v5 = vld [vmem:[%s1513_s1 + $0x10] sm:$0xff]  ;;  %s1016_s8 = sshll.u32 %s1522_s27, 2 }
   0xe   : > { %1237 = vmatpush.bf16.msra.mxu2 %v1140_v0  ;;  %1238 = vmatpush.bf16.msra.mxu3 %v1140_v0  ;;  %v1134_v6 = vld [vmem:[%s1513_s1 + $0x8] sm:$0xff]  ;;  %v1133_v7 = vld [vmem:[%s1513_s1] sm:$0xff]  ;;  %s1388_s13 = scalar_lea.vmem %s1512_s0, %s1016_s8  ;;  %s1429_s23 = scalar_lea.vmem %s1516_s4, %s1016_s8 }
   0xf   : > { %v1117_v8 = vld [vmem:[%s1388_s13] sm:$0xff]  ;;  %v1118_v12 = vld [vmem:[%s1388_s13 + $0x8] sm:$0xff]  ;;  %v1119_v16 = vld [vmem:[%s1388_s13 + $0x10] sm:$0xff] }
  0x10   : > { %v1121_v9 = vld [vmem:[%s1388_s13 + $0x20] sm:$0xff]  ;;  %v1122_v13 = vld [vmem:[%s1388_s13 + $0x28] sm:$0xff]  ;;  %v1123_v17 = vld [vmem:[%s1388_s13 + $0x30] sm:$0xff] }
  0x11   : > { %561 = vmatpush.bf16.msra.mxu0 %v1139_v1  ;;  %1239 = vmatpush.bf16.msra.mxu1 %v1139_v1  ;;  %v1125_v10 = vld [vmem:[%s1388_s13 + $0x40] sm:$0xff]  ;;  %v1126_v14 = vld [vmem:[%s1388_s13 + $0x48] sm:$0xff]  ;;  %v1127_v18 = vld [vmem:[%s1388_s13 + $0x50] sm:$0xff] }
  0x12   : > { %1240 = vmatpush.bf16.msra.mxu2 %v1139_v1  ;;  %1241 = vmatpush.bf16.msra.mxu3 %v1139_v1  ;;  %v1129_v11 = vld [vmem:[%s1388_s13 + $0x60] sm:$0xff]  ;;  %v1130_v15 = vld [vmem:[%s1388_s13 + $0x68] sm:$0xff]  ;;  %v1131_v19 = vld [vmem:[%s1388_s13 + $0x70] sm:$0xff] }
  0x13   : > { %v1120_v20 = vld [vmem:[%s1388_s13 + $0x18] sm:$0xff]  ;;  %v1409_v26 = vld [vmem:[%s1514_s2] ss:$0 sm:$0xff] }
  0x14   : > { %v1124_v21 = vld [vmem:[%s1388_s13 + $0x38] sm:$0xff]  ;;  %v1415_v28 = vld [vmem:[%s1515_s3] ss:$0 sm:$0xff] }
  0x15   : > { %562 = vmatpush.bf16.msra.mxu0 %v1138_v2  ;;  %1242 = vmatpush.bf16.msra.mxu1 %v1138_v2  ;;  %v1128_v22 = vld [vmem:[%s1388_s13 + $0x58] sm:$0xff] }
  0x16   : > { %1243 = vmatpush.bf16.msra.mxu2 %v1138_v2  ;;  %1244 = vmatpush.bf16.msra.mxu3 %v1138_v2  ;;  %v1132_v23 = vld [vmem:[%s1388_s13 + $0x78] sm:$0xff] }
  0x19   : > { %563 = vmatpush.bf16.msra.mxu0 %v1137_v3  ;;  %1245 = vmatpush.bf16.msra.mxu1 %v1137_v3 }
  0x1a   : > { %1246 = vmatpush.bf16.msra.mxu2 %v1137_v3  ;;  %1247 = vmatpush.bf16.msra.mxu3 %v1137_v3 }
  0x1d   : > { %564 = vmatpush.bf16.msra.mxu0 %v1136_v4  ;;  %1248 = vmatpush.bf16.msra.mxu1 %v1136_v4 }
  0x1e   : > { %1249 = vmatpush.bf16.msra.mxu2 %v1136_v4  ;;  %1250 = vmatpush.bf16.msra.mxu3 %v1136_v4 }
  0x21   : > { %565 = vmatpush.bf16.msra.mxu0 %v1135_v5  ;;  %1251 = vmatpush.bf16.msra.mxu1 %v1135_v5 }
  0x22   : > { %1252 = vmatpush.bf16.msra.mxu2 %v1135_v5  ;;  %1253 = vmatpush.bf16.msra.mxu3 %v1135_v5 }
  0x25   : > { %566 = vmatpush.bf16.msra.mxu0 %v1134_v6  ;;  %1254 = vmatpush.bf16.msra.mxu1 %v1134_v6 }
  0x26   : > { %1255 = vmatpush.bf16.msra.mxu2 %v1134_v6  ;;  %1256 = vmatpush.bf16.msra.mxu3 %v1134_v6 }
  0x29   : > { %567 = vmatpush.bf16.msra.mxu0 %v1133_v7  ;;  %1257 = vmatpush.bf16.msra.mxu1 %v1133_v7 }
  0x2a   : > { %1258 = vmatpush.bf16.msra.mxu2 %v1133_v7  ;;  %1259 = vmatpush.bf16.msra.mxu3 %v1133_v7 }
  0x2c   : > { %568 = vmatmul.bf16.vlgmr.msra.gmra.mxu0 %v1117_v8  ;;  %588 = vmatmul.bf16.vlgmr.msra.gmra.mxu1 %v1121_v9 }
  0x2d   : > { %608 = vmatmul.bf16.vlgmr.msra.gmra.mxu2 %v1125_v10  ;;  %628 = vmatmul.bf16.vlgmr.msra.gmra.mxu3 %v1129_v11 }
  0x3c   : > { %573 = vmatmul.bf16.gmra.mxu0 %v1118_v12  ;;  %593 = vmatmul.bf16.gmra.mxu1 %v1122_v13 }
  0x3d   : > { %613 = vmatmul.bf16.gmra.mxu2 %v1126_v14  ;;  %633 = vmatmul.bf16.gmra.mxu3 %v1130_v15 }
  0x4c   : > { %578 = vmatmul.bf16.gmra.mxu0 %v1119_v16  ;;  %598 = vmatmul.bf16.gmra.mxu1 %v1123_v17 }
  0x4d   : > { %618 = vmatmul.bf16.gmra.mxu2 %v1127_v18  ;;  %638 = vmatmul.bf16.gmra.mxu3 %v1131_v19 }
  0x5c   : > { %583 = vmatmul.bf16.gmra.mxu0 %v1120_v20  ;;  %603 = vmatmul.bf16.gmra.mxu1 %v1124_v21 }
  0x5d   : > { %623 = vmatmul.bf16.gmra.mxu2 %v1128_v22  ;;  %643 = vmatmul.bf16.gmra.mxu3 %v1132_v23 }
  0xa9   : > { %v569_v24 = vpop.f32.mrf.mxu0  ;;  %v589_v25 = vpop.f32.mrf.mxu1 }
  0xaa   : > { %v752_v27 = vmul.f32 %v1409_v26, %v569_v24  ;;  %v760_v29 = vmul.f32 %v1409_v26, %v589_v25 }
  0xac   : > { %v788_v36 = vadd.f32 %v1415_v28, %v752_v27  ;;  %v796_v37 = vadd.f32 %v1415_v28, %v760_v29 }
  0xb0   : > { %v609_v30 = vpop.f32.mrf.mxu2  ;;  %v629_v31 = vpop.f32.mrf.mxu3 }
  0xb1   : > { %v571_v32 = vpop.f32.mrf.mxu0  ;;  %v591_v33 = vpop.f32.mrf.mxu1  ;;  %v768_v42 = vmul.f32 %v1409_v26, %v609_v30  ;;  %v776_v43 = vmul.f32 %v1409_v26, %v629_v31 }
  0xb2   : > { %v753_v34 = vmul.f32 %v1409_v26, %v571_v32  ;;  %v761_v35 = vmul.f32 %v1409_v26, %v591_v33 }
  0xb3   : > { %v804_v50 = vadd.f32 %v1415_v28, %v768_v42  ;;  %v812_v51 = vadd.f32 %v1415_v28, %v776_v43 }
  0xb4   : > { %v789_v38 = vadd.f32 %v1415_v28, %v753_v34  ;;  %v797_v39 = vadd.f32 %v1415_v28, %v761_v35 }
  0xb6   : > { %v1144_v40 = vpack.c.bf16 %v789_v38, %v788_v36  ;;  %v1164_v41 = vpack.c.bf16 %v797_v39, %v796_v37 }
  0xb8   : > { %1145 = vst [vmem:[%s1429_s23] sm:$0xff] %v1144_v40   ;;  %v611_v44 = vpop.f32.mrf.mxu2  ;;  %v631_v45 = vpop.f32.mrf.mxu3 }
  0xb9   : > { %1224 = vst [vmem:[%s1429_s23 + $0x20] sm:$0xff] %v1164_v41   ;;  %v769_v46 = vmul.f32 %v1409_v26, %v611_v44  ;;  %v777_v47 = vmul.f32 %v1409_v26, %v631_v45  ;;  %v574_v48 = vpop.f32.mrf.mxu0  ;;  %v594_v49 = vpop.f32.mrf.mxu1 }
  0xba   : > { %v754_v56 = vmul.f32 %v1409_v26, %v574_v48  ;;  %v762_v57 = vmul.f32 %v1409_v26, %v594_v49 }
  0xbb   : > { %v805_v52 = vadd.f32 %v1415_v28, %v769_v46  ;;  %v813_v53 = vadd.f32 %v1415_v28, %v777_v47 }
  0xbc   : > { %v790_v0 = vadd.f32 %v1415_v28, %v754_v56  ;;  %v798_v1 = vadd.f32 %v1415_v28, %v762_v57 }
  0xbd   : > { %v1184_v54 = vpack.c.bf16 %v805_v52, %v804_v50  ;;  %v1204_v55 = vpack.c.bf16 %v813_v53, %v812_v51 }
  0xbf   : > { %1228 = vst [vmem:[%s1429_s23 + $0x40] sm:$0xff] %v1184_v54  }
  0xc0   : > { %1232 = vst [vmem:[%s1429_s23 + $0x60] sm:$0xff] %v1204_v55   ;;  %v614_v58 = vpop.f32.mrf.mxu2  ;;  %v634_v59 = vpop.f32.mrf.mxu3 }
  0xc1   : > { %v576_v60 = vpop.f32.mrf.mxu0  ;;  %v596_v61 = vpop.f32.mrf.mxu1  ;;  %v770_v6 = vmul.f32 %v1409_v26, %v614_v58  ;;  %v778_v7 = vmul.f32 %v1409_v26, %v634_v59 }
  0xc2   : > { %v755_v62 = vmul.f32 %v1409_v26, %v576_v60  ;;  %v763_v63 = vmul.f32 %v1409_v26, %v596_v61 }
  0xc3   : > { %v806_v14 = vadd.f32 %v1415_v28, %v770_v6  ;;  %v814_v15 = vadd.f32 %v1415_v28, %v778_v7 }
  0xc4   : > { %v791_v2 = vadd.f32 %v1415_v28, %v755_v62  ;;  %v799_v3 = vadd.f32 %v1415_v28, %v763_v63 }
  0xc6   : > { %v1149_v4 = vpack.c.bf16 %v791_v2, %v790_v0  ;;  %v1169_v5 = vpack.c.bf16 %v799_v3, %v798_v1 }
  0xc8   : > { %1221 = vst [vmem:[%s1429_s23 + $0x8] sm:$0xff] %v1149_v4   ;;  %v616_v8 = vpop.f32.mrf.mxu2  ;;  %v636_v9 = vpop.f32.mrf.mxu3 }
  0xc9   : > { %1225 = vst [vmem:[%s1429_s23 + $0x28] sm:$0xff] %v1169_v5   ;;  %v771_v10 = vmul.f32 %v1409_v26, %v616_v8  ;;  %v779_v11 = vmul.f32 %v1409_v26, %v636_v9  ;;  %v579_v12 = vpop.f32.mrf.mxu0  ;;  %v599_v13 = vpop.f32.mrf.mxu1 }
  0xca   : > { %v756_v20 = vmul.f32 %v1409_v26, %v579_v12  ;;  %v764_v21 = vmul.f32 %v1409_v26, %v599_v13 }
  0xcb   : > { %v807_v16 = vadd.f32 %v1415_v28, %v771_v10  ;;  %v815_v17 = vadd.f32 %v1415_v28, %v779_v11 }
  0xcc   : > { %v792_v30 = vadd.f32 %v1415_v28, %v756_v20  ;;  %v800_v31 = vadd.f32 %v1415_v28, %v764_v21 }
  0xcd   : > { %v1189_v18 = vpack.c.bf16 %v807_v16, %v806_v14  ;;  %v1209_v19 = vpack.c.bf16 %v815_v17, %v814_v15 }
  0xcf   : > { %1229 = vst [vmem:[%s1429_s23 + $0x48] sm:$0xff] %v1189_v18  }
  0xd0   : > { %1233 = vst [vmem:[%s1429_s23 + $0x68] sm:$0xff] %v1209_v19   ;;  %v619_v22 = vpop.f32.mrf.mxu2  ;;  %v639_v23 = vpop.f32.mrf.mxu3 }
  0xd1   : > { %v581_v24 = vpop.f32.mrf.mxu0  ;;  %v601_v25 = vpop.f32.mrf.mxu1  ;;  %v772_v36 = vmul.f32 %v1409_v26, %v619_v22  ;;  %v780_v37 = vmul.f32 %v1409_v26, %v639_v23 }
  0xd2   : > { %v757_v27 = vmul.f32 %v1409_v26, %v581_v24  ;;  %v765_v29 = vmul.f32 %v1409_v26, %v601_v25 }
  0xd3   : > { %v808_v44 = vadd.f32 %v1415_v28, %v772_v36  ;;  %v816_v45 = vadd.f32 %v1415_v28, %v780_v37 }
  0xd4   : > { %v793_v32 = vadd.f32 %v1415_v28, %v757_v27  ;;  %v801_v33 = vadd.f32 %v1415_v28, %v765_v29 }
  0xd6   : > { %v1154_v34 = vpack.c.bf16 %v793_v32, %v792_v30  ;;  %v1174_v35 = vpack.c.bf16 %v801_v33, %v800_v31 }
  0xd8   : > { %1222 = vst [vmem:[%s1429_s23 + $0x10] sm:$0xff] %v1154_v34   ;;  %v621_v38 = vpop.f32.mrf.mxu2  ;;  %v641_v39 = vpop.f32.mrf.mxu3 }
  0xd9   : > { %1226 = vst [vmem:[%s1429_s23 + $0x30] sm:$0xff] %v1174_v35   ;;  %v773_v40 = vmul.f32 %v1409_v26, %v621_v38  ;;  %v781_v41 = vmul.f32 %v1409_v26, %v641_v39  ;;  %v584_v42 = vpop.f32.mrf.mxu0  ;;  %v604_v43 = vpop.f32.mrf.mxu1 }
  0xda   : > { %v758_v50 = vmul.f32 %v1409_v26, %v584_v42  ;;  %v766_v51 = vmul.f32 %v1409_v26, %v604_v43 }
  0xdb   : > { %v809_v46 = vadd.f32 %v1415_v28, %v773_v40  ;;  %v817_v47 = vadd.f32 %v1415_v28, %v781_v41 }
  0xdc   : > { %v794_v58 = vadd.f32 %v1415_v28, %v758_v50  ;;  %v802_v59 = vadd.f32 %v1415_v28, %v766_v51 }
  0xdd   : > { %v1194_v48 = vpack.c.bf16 %v809_v46, %v808_v44  ;;  %v1214_v49 = vpack.c.bf16 %v817_v47, %v816_v45 }
  0xdf   : > { %1230 = vst [vmem:[%s1429_s23 + $0x50] sm:$0xff] %v1194_v48  }
  0xe0   : > { %1234 = vst [vmem:[%s1429_s23 + $0x70] sm:$0xff] %v1214_v49   ;;  %v624_v52 = vpop.f32.mrf.mxu2  ;;  %v644_v53 = vpop.f32.mrf.mxu3 }
  0xe1   : > { %v586_v54 = vpop.f32.mrf.mxu0  ;;  %v606_v55 = vpop.f32.mrf.mxu1  ;;  %v774_v0 = vmul.f32 %v1409_v26, %v624_v52  ;;  %v782_v1 = vmul.f32 %v1409_v26, %v644_v53 }
  0xe2   : > { %v759_v56 = vmul.f32 %v1409_v26, %v586_v54  ;;  %v767_v57 = vmul.f32 %v1409_v26, %v606_v55 }
  0xe3   : > { %v810_v6 = vadd.f32 %v1415_v28, %v774_v0  ;;  %v818_v7 = vadd.f32 %v1415_v28, %v782_v1 }
  0xe4   : > { %v795_v60 = vadd.f32 %v1415_v28, %v759_v56  ;;  %v803_v61 = vadd.f32 %v1415_v28, %v767_v57 }
  0xe6   : > { %v1159_v62 = vpack.c.bf16 %v795_v60, %v794_v58  ;;  %v1179_v63 = vpack.c.bf16 %v803_v61, %v802_v59 }
  0xe8   : > { %1223 = vst [vmem:[%s1429_s23 + $0x18] sm:$0xff] %v1159_v62   ;;  %v626_v2 = vpop.f32.mrf.mxu2  ;;  %v646_v3 = vpop.f32.mrf.mxu3 }
  0xe9   : > { %1227 = vst [vmem:[%s1429_s23 + $0x38] sm:$0xff] %v1179_v63   ;;  %v775_v4 = vmul.f32 %v1409_v26, %v626_v2  ;;  %v783_v5 = vmul.f32 %v1409_v26, %v646_v3 }
  0xeb   : > { %v811_v8 = vadd.f32 %v1415_v28, %v775_v4  ;;  %v819_v9 = vadd.f32 %v1415_v28, %v783_v5 }
  0xed   : > { %v1199_v10 = vpack.c.bf16 %v811_v8, %v810_v6  ;;  %v1219_v11 = vpack.c.bf16 %v819_v9, %v818_v7 }
  0xef   : > { %1231 = vst [vmem:[%s1429_s23 + $0x58] sm:$0xff] %v1199_v10  }
  0xf0   : > { %1235 = vst [vmem:[%s1429_s23 + $0x78] sm:$0xff] %v1219_v11  }
  0xf1 PF: > { %s14_s17 = sadd.s32 1, %s1308_s17   ;;  %s1517_s15 = smov %s1304_s16 }
  0xf2   : > { %p11_p5 = scmp.ge.s32.totalorder %s14_s17, 4   ;;  %s1518_s16 = smov %s1520_s18 }
  0xf4   :  { %13 = sbr.rel (!%p11_p5) target bundleno = 2 (0x2), region = 83 }

</bundles_post_ra>
